<compile_context>
chip_gen: v7x
topology: tpu7x:2x2x1
jax: 0.10.0
libtpu: 0.0.40
codegen_flags: <defaults>
</compile_context>

<pallas_src>
from functools import partial

import jax
import jax.numpy as jnp
from jax.experimental import pallas as pl
from jax.experimental.pallas import tpu as pltpu

_F32_EPS = float(jnp.finfo(jnp.float32).eps)

# Explicit scoped-VMEM ceiling: fits v7x's 64 MiB physical VMEM with headroom,
# plenty of slack on v5e/v6e (128 MiB).
_VMEM_LIMIT = 48 * 1024 * 1024
# Per-input, per-pipeline-buffer tile budget (4 feature inputs x 2 buffers).
_PER_INPUT_TILE_BUDGET = 2 * 1024 * 1024
_MAX_CHANNEL_UNROLL = 32


def _pick_channel_tile(n, c, hw, itemsize):
    """Channels per grid step: largest tile fitting the VMEM budget that is
    either the full C or a multiple of 8 dividing C (TPU (8,128) block rule)."""
    per_ch = max(1, n * hw * itemsize)
    cap = max(1, min(_PER_INPUT_TILE_BUDGET // per_ch, _MAX_CHANNEL_UNROLL))
    if c <= cap:
        return c
    tc = (min(cap, c) // 8) * 8
    while tc >= 8:
        if c % tc == 0:
            return tc
        tc -= 8
    return c  # fallback: single block over channels (correctness over tiling)


# ----------------------------------------------------------------------------
# Kernel 1: fused feature losses (cc_B, cc_D, infoNCE moments)
# ----------------------------------------------------------------------------
def _cc_rows_sum(x, y):
    """Sum over rows of the clipped Pearson correlation of (n, hw) rows."""
    inv_cols = 1.0 / x.shape[-1]
    xm = jnp.sum(x, axis=-1, keepdims=True) * inv_cols
    ym = jnp.sum(y, axis=-1, keepdims=True) * inv_cols
    xc = x - xm
    yc = y - ym
    num = jnp.sum(xc * yc, axis=-1, keepdims=True)
    var = jnp.sum(xc * xc, axis=-1, keepdims=True) * jnp.sum(yc * yc, axis=-1, keepdims=True)
    den = _F32_EPS + jnp.sqrt(var)
    # EUP reciprocal keeps the divide off the VALU critical path.
    ccv = jnp.clip(num * pl.reciprocal(den, approx=True), -1.0, 1.0)
    return jnp.sum(ccv)


def _feature_kernel(fvb_ref, fib_ref, fvd_ref, fid_ref,
                    ccb_ref, ccd_ref, sx_ref, sy_ref, gram_ref, *, n, tc):
    """One channel-tile: partial cc sums, partial norms, partial Gram matrix."""
    ccb = jnp.float32(0.0)
    ccd = jnp.float32(0.0)
    sx = jnp.zeros((n, 1), jnp.float32)
    sy = jnp.zeros((n, 1), jnp.float32)
    pg = jnp.zeros((n, n), jnp.float32)

    for ch in range(tc):  # tc is static; unrolled, all math on lane-aligned 2D tiles
        xb = fvb_ref[:, ch, :].astype(jnp.float32)   # (n, hw)
        yb = fib_ref[:, ch, :].astype(jnp.float32)
        xd = fvd_ref[:, ch, :].astype(jnp.float32)
        yd = fid_ref[:, ch, :].astype(jnp.float32)

        ccb = ccb + _cc_rows_sum(xb, yb)
        ccd = ccd + _cc_rows_sum(xd, yd)

        sx = sx + jnp.sum(xb * xb, axis=-1, keepdims=True)
        sy = sy + jnp.sum(yb * yb, axis=-1, keepdims=True)

        # Partial Gram over this channel slice (K-tiled contraction of C*H*W).
        pg = pg + jax.lax.dot_general(xb, yb, (((1,), (1,)), ((), ())),
                                      preferred_element_type=jnp.float32)

    ccb_ref[...] = jnp.full((1, 1), ccb, jnp.float32)
    ccd_ref[...] = jnp.full((1, 1), ccd, jnp.float32)
    sx_ref[...] = sx
    sy_ref[...] = sy
    gram_ref[...] = pg


def feature_losses(f_v_b, f_i_b, f_v_d, f_i_d, temperature=0.1):
    """Returns (cc_loss_B, cc_loss_D, infoNCE_loss) with one HBM pass per tensor."""
    n, c, h, w = f_v_b.shape
    hw = h * w
    vb = f_v_b.reshape(n, c, hw)   # reshape only; native dtype goes into the kernel
    ib = f_i_b.reshape(n, c, hw)
    vd = f_v_d.reshape(n, c, hw)
    fd = f_i_d.reshape(n, c, hw)

    tc = _pick_channel_tile(n, c, hw, vb.dtype.itemsize)
    g = c // tc

    feat_spec = pl.BlockSpec((n, tc, hw), lambda ci: (0, ci, 0))

    ccb_p, ccd_p, sx_p, sy_p, gram_p = pl.pallas_call(
        partial(_feature_kernel, n=n, tc=tc),
        grid=(g,),
        in_specs=[feat_spec] * 4,
        out_specs=(
            pl.BlockSpec((None, 1, 1), lambda ci: (ci, 0, 0)),
            pl.BlockSpec((None, 1, 1), lambda ci: (ci, 0, 0)),
            pl.BlockSpec((None, n, 1), lambda ci: (ci, 0, 0)),
            pl.BlockSpec((None, n, 1), lambda ci: (ci, 0, 0)),
            pl.BlockSpec((None, n, n), lambda ci: (ci, 0, 0)),
        ),
        out_shape=(
            jax.ShapeDtypeStruct((g, 1, 1), jnp.float32),
            jax.ShapeDtypeStruct((g, 1, 1), jnp.float32),
            jax.ShapeDtypeStruct((g, n, 1), jnp.float32),
            jax.ShapeDtypeStruct((g, n, 1), jnp.float32),
            jax.ShapeDtypeStruct((g, n, n), jnp.float32),
        ),
        compiler_params=pltpu.CompilerParams(
            dimension_semantics=("parallel",),
            vmem_limit_bytes=_VMEM_LIMIT),
    )(vb, ib, vd, fd)

    # Tiny finalisation in plain JAX.
    rows = float(n * c)
    cc_b = jnp.sum(ccb_p) / rows
    cc_d = jnp.sum(ccd_p) / rows

    gram = jnp.sum(gram_p, axis=0)                       # (n, n)
    nx = jnp.maximum(jnp.sqrt(jnp.sum(sx_p, axis=0)[:, 0]), 1e-12)
    ny = jnp.maximum(jnp.sqrt(jnp.sum(sy_p, axis=0)[:, 0]), 1e-12)
    sim = gram / (nx[:, None] * ny[None, :]) / temperature
    m = jnp.max(sim, axis=-1)
    lse = m + jnp.log(jnp.sum(jnp.exp(sim - m[:, None]), axis=-1))
    ince = jnp.mean(lse - jnp.diagonal(sim))             # CE vs identity labels
    return cc_b, cc_d, ince


# ----------------------------------------------------------------------------
# Kernel 2: Fusionloss (L1 intensity + 10 * L1 of separable Sobel gradients)
# ----------------------------------------------------------------------------
def _blur_matrix(k):
    """Tridiagonal [1, 2, 1] (zero-padded conv boundary semantics)."""
    r = jax.lax.broadcasted_iota(jnp.int32, (k, k), 0)
    c = jax.lax.broadcasted_iota(jnp.int32, (k, k), 1)
    d = r - c
    return (jnp.where(d == 0, 2.0, 0.0) + jnp.where(jnp.abs(d) == 1, 1.0, 0.0)
            ).astype(jnp.float32)


def _diff_matrix(k):
    """M[i, j] = +1 if i == j + 1, -1 if i == j - 1 (central difference)."""
    r = jax.lax.broadcasted_iota(jnp.int32, (k, k), 0)
    c = jax.lax.broadcasted_iota(jnp.int32, (k, k), 1)
    d = r - c
    return (jnp.where(d == 1, 1.0, 0.0) - jnp.where(d == -1, 1.0, 0.0)
            ).astype(jnp.float32)


def _fusion_kernel(vi_ref, ir_ref, gen_ref, in_ref, grad_ref, *, h, w):
    y = vi_ref[...].astype(jnp.float32)    # (h, w), channel 0 selected by BlockSpec
    ir = ir_ref[...].astype(jnp.float32)
    g = gen_ref[...].astype(jnp.float32)

    bh = _blur_matrix(h)
    dh = _diff_matrix(h)
    if w == h:
        bw, dw = bh, dh
    else:
        bw = _blur_matrix(w)
        dw = _diff_matrix(w)

    def sobel(img):
        # gx = (vertical [1,2,1] blur) then horizontal +/-1 difference
        gx = jnp.dot(jnp.dot(bh, img, preferred_element_type=jnp.float32), dw,
                     preferred_element_type=jnp.float32)
        # gy = (horizontal [1,2,1] blur) then vertical +/-1 difference
        gy = jnp.dot(dh, jnp.dot(img, bw, preferred_element_type=jnp.float32),
                     preferred_element_type=jnp.float32)
        return jnp.abs(gx) + jnp.abs(gy)

    in_ref[...] = jnp.sum(jnp.abs(jnp.maximum(y, ir) - g), keepdims=True)
    grad = jnp.abs(jnp.maximum(sobel(y), sobel(ir)) - sobel(g))
    grad_ref[...] = jnp.sum(grad, keepdims=True)


def fusion_loss(img_vi, img_ir, fused_img):
    n, _, h, w = img_vi.shape
    img_spec = pl.BlockSpec((None, None, h, w), lambda i: (i, 0, 0, 0))
    part_spec = pl.BlockSpec((None, 1, 1), lambda i: (i, 0, 0))

    in_parts, grad_parts = pl.pallas_call(
        partial(_fusion_kernel, h=h, w=w),
        grid=(n,),
        in_specs=[img_spec, img_spec, img_spec],
        out_specs=(part_spec, part_spec),
        out_shape=(jax.ShapeDtypeStruct((n, 1, 1), jnp.float32),
                   jax.ShapeDtypeStruct((n, 1, 1), jnp.float32)),
        compiler_params=pltpu.CompilerParams(
            dimension_semantics=("parallel",),
            vmem_limit_bytes=_VMEM_LIMIT),
    )(img_vi, img_ir, fused_img)

    denom = float(n * h * w)
    return jnp.sum(in_parts) / denom + 10.0 * (jnp.sum(grad_parts) / denom)


# ----------------------------------------------------------------------------
# SetCriterion_Ahead forward
# ----------------------------------------------------------------------------
def set_criterion_ahead(outputs, img_VI, img_IR,
                        coeff_decomp=2.0, coeff_nice=0.1, coeff_cc_basic=2.0,
                        coeff_gauss=1.0, coeff_laplace=1.0, temperature=0.1):
    # ---- get_loss_1 ----
    cc_loss_B, cc_loss_D, ince = feature_losses(
        outputs['feature_V_B'], outputs['feature_I_B'],
        outputs['feature_V_D'], outputs['feature_I_D'],
        temperature=temperature)
    cc_loss = coeff_decomp * cc_loss_D ** 2 / (1.01 + cc_loss_B)
    # TODO(synk): kernelLoss('gaussian'/'laplace') is undefined in the provided
    # source; gauss_loss / laplace_loss terms are omitted (treated as 0).
    mmd_loss = coeff_cc_basic * cc_loss_B + coeff_nice * ince
    loss1 = cc_loss + mmd_loss
    # ---- get_loss_2 (reference intentionally re-adds the same cc term) ----
    fusionloss = fusion_loss(img_VI, img_IR, outputs['fused_img'])
    loss2 = fusionloss + cc_loss
    return loss1 + loss2


# ----------------------------------------------------------------------------
if __name__ == "__main__":
    key = jax.random.PRNGKey(0)
    ks = jax.random.split(key, 8)
    N, C, H, W = 2, 4, 16, 16

    outputs = {
        'fused_img':   jax.random.uniform(ks[0], (N, 1, H, W), jnp.float32),
        'feature_V_B': jax.random.normal(ks[1], (N, C, H, W), jnp.float32),
        'feature_V_D': jax.random.normal(ks[2], (N, C, H, W), jnp.float32),
        'feature_I_B': jax.random.normal(ks[3], (N, C, H, W), jnp.float32),
        'feature_I_D': jax.random.normal(ks[4], (N, C, H, W), jnp.float32),
    }
    img_VI = jax.random.uniform(ks[5], (N, 1, H, W), jnp.float32)
    img_IR = jax.random.uniform(ks[6], (N, 1, H, W), jnp.float32)

    loss = set_criterion_ahead(outputs, img_VI, img_IR)
    loss = jax.block_until_ready(loss)
    assert jnp.isfinite(loss)
    print("KERNEL_OK")
</pallas_src>

<mosaic_0001>
module attributes {stable_mosaic.version = 11 : i64} {
  func.func @_feature_kernel(%arg0: i32, %arg1: memref<2x4x256xf32, #tpu.memory_space<vmem>>, %arg2: memref<2x4x256xf32, #tpu.memory_space<vmem>>, %arg3: memref<2x4x256xf32, #tpu.memory_space<vmem>>, %arg4: memref<2x4x256xf32, #tpu.memory_space<vmem>>, %arg5: memref<1x1x1xf32, #tpu.memory_space<vmem>>, %arg6: memref<1x1x1xf32, #tpu.memory_space<vmem>>, %arg7: memref<1x2x1xf32, #tpu.memory_space<vmem>>, %arg8: memref<1x2x1xf32, #tpu.memory_space<vmem>>, %arg9: memref<1x2x2xf32, #tpu.memory_space<vmem>>) attributes {dimension_semantics = [#tpu.dimension_semantics<parallel>], iteration_bounds = array<i64: 1>, scalar_prefetch = 0 : i64, scratch_operands = 0 : i64, tpu.core_type = #tpu.core_type<tc>, window_params = [{transform_indices = @transform_0, window_bounds = array<i64: 2, 4, 256>}, {transform_indices = @transform_1, window_bounds = array<i64: 2, 4, 256>}, {transform_indices = @transform_2, window_bounds = array<i64: 2, 4, 256>}, {transform_indices = @transform_3, window_bounds = array<i64: 2, 4, 256>}, {transform_indices = @transform_4, window_bounds = array<i64: 1, 1, 1>}, {transform_indices = @transform_5, window_bounds = array<i64: 1, 1, 1>}, {transform_indices = @transform_6, window_bounds = array<i64: 1, 2, 1>}, {transform_indices = @transform_7, window_bounds = array<i64: 1, 2, 1>}, {transform_indices = @transform_8, window_bounds = array<i64: 1, 2, 2>}]} {
    %cst = arith.constant 0.000000e+00 : f32
    %0 = vector.broadcast %cst : f32 to vector<2x1xf32>
    %cst_0 = arith.constant 0.000000e+00 : f32
    %1 = vector.broadcast %cst_0 : f32 to vector<2x1xf32>
    %cst_1 = arith.constant 0.000000e+00 : f32
    %2 = vector.broadcast %cst_1 : f32 to vector<2x2xf32>
    %c0 = arith.constant 0 : index
    %c0_2 = arith.constant 0 : index
    %c0_3 = arith.constant 0 : index
    %3 = vector.load %arg1[%c0, %c0_2, %c0_3] : memref<2x4x256xf32, #tpu.memory_space<vmem>>, vector<2x1x256xf32>
    %4 = vector.shape_cast %3 : vector<2x1x256xf32> to vector<2x256xf32>
    %c0_4 = arith.constant 0 : index
    %c0_5 = arith.constant 0 : index
    %c0_6 = arith.constant 0 : index
    %5 = vector.load %arg2[%c0_4, %c0_5, %c0_6] : memref<2x4x256xf32, #tpu.memory_space<vmem>>, vector<2x1x256xf32>
    %6 = vector.shape_cast %5 : vector<2x1x256xf32> to vector<2x256xf32>
    %c0_7 = arith.constant 0 : index
    %c0_8 = arith.constant 0 : index
    %c0_9 = arith.constant 0 : index
    %7 = vector.load %arg3[%c0_7, %c0_8, %c0_9] : memref<2x4x256xf32, #tpu.memory_space<vmem>>, vector<2x1x256xf32>
    %8 = vector.shape_cast %7 : vector<2x1x256xf32> to vector<2x256xf32>
    %c0_10 = arith.constant 0 : index
    %c0_11 = arith.constant 0 : index
    %c0_12 = arith.constant 0 : index
    %9 = vector.load %arg4[%c0_10, %c0_11, %c0_12] : memref<2x4x256xf32, #tpu.memory_space<vmem>>, vector<2x1x256xf32>
    %10 = vector.shape_cast %9 : vector<2x1x256xf32> to vector<2x256xf32>
    %cst_13 = arith.constant dense<0.000000e+00> : vector<2xf32>
    %11 = vector.multi_reduction <add>, %4, %cst_13 [1] : vector<2x256xf32> to vector<2xf32>
    %12 = vector.shape_cast %11 : vector<2xf32> to vector<2x1xf32>
    %cst_14 = arith.constant 3.906250e-03 : f32
    %13 = vector.broadcast %cst_14 : f32 to vector<2x1xf32>
    %14 = arith.mulf %12, %13 : vector<2x1xf32>
    %cst_15 = arith.constant dense<0.000000e+00> : vector<2xf32>
    %15 = vector.multi_reduction <add>, %6, %cst_15 [1] : vector<2x256xf32> to vector<2xf32>
    %16 = vector.shape_cast %15 : vector<2xf32> to vector<2x1xf32>
    %cst_16 = arith.constant 3.906250e-03 : f32
    %17 = vector.broadcast %cst_16 : f32 to vector<2x1xf32>
    %18 = arith.mulf %16, %17 : vector<2x1xf32>
    %19 = vector.broadcast %14 : vector<2x1xf32> to vector<2x256xf32>
    %20 = arith.subf %4, %19 : vector<2x256xf32>
    %21 = vector.broadcast %18 : vector<2x1xf32> to vector<2x256xf32>
    %22 = arith.subf %6, %21 : vector<2x256xf32>
    %23 = arith.mulf %20, %22 : vector<2x256xf32>
    %cst_17 = arith.constant dense<0.000000e+00> : vector<2xf32>
    %24 = vector.multi_reduction <add>, %23, %cst_17 [1] : vector<2x256xf32> to vector<2xf32>
    %25 = vector.shape_cast %24 : vector<2xf32> to vector<2x1xf32>
    %26 = arith.mulf %20, %20 : vector<2x256xf32>
    %cst_18 = arith.constant dense<0.000000e+00> : vector<2xf32>
    %27 = vector.multi_reduction <add>, %26, %cst_18 [1] : vector<2x256xf32> to vector<2xf32>
    %28 = vector.shape_cast %27 : vector<2xf32> to vector<2x1xf32>
    %29 = arith.mulf %22, %22 : vector<2x256xf32>
    %cst_19 = arith.constant dense<0.000000e+00> : vector<2xf32>
    %30 = vector.multi_reduction <add>, %29, %cst_19 [1] : vector<2x256xf32> to vector<2xf32>
    %31 = vector.shape_cast %30 : vector<2xf32> to vector<2x1xf32>
    %32 = arith.mulf %28, %31 : vector<2x1xf32>
    %33 = math.sqrt %32 : vector<2x1xf32>
    %cst_20 = arith.constant 1.1920929E-7 : f32
    %34 = vector.broadcast %cst_20 : f32 to vector<2x1xf32>
    %35 = arith.addf %34, %33 : vector<2x1xf32>
    %36 = tpu.reciprocal %35 {approx = true} : vector<2x1xf32> -> vector<2x1xf32>
    %37 = arith.mulf %25, %36 : vector<2x1xf32>
    %cst_21 = arith.constant -1.000000e+00 : f32
    %cst_22 = arith.constant 1.000000e+00 : f32
    %38 = vector.broadcast %cst_21 : f32 to vector<2x1xf32>
    %39 = arith.maximumf %38, %37 : vector<2x1xf32>
    %40 = vector.broadcast %cst_22 : f32 to vector<2x1xf32>
    %41 = arith.minimumf %40, %39 : vector<2x1xf32>
    %42 = vector.shape_cast %41 : vector<2x1xf32> to vector<1x2x1xf32>
    %cst_23 = arith.constant dense<0.000000e+00> : vector<1xf32>
    %43 = vector.multi_reduction <add>, %42, %cst_23 [1, 2] : vector<1x2x1xf32> to vector<1xf32>
    %44 = vector.shape_cast %43 : vector<1xf32> to vector<1x1x1xf32>
    %45 = vector.extract %44[0, 0, 0] : f32 from vector<1x1x1xf32>
    %cst_24 = arith.constant 0.000000e+00 : f32
    %46 = arith.addf %cst_24, %45 : f32
    %cst_25 = arith.constant dense<0.000000e+00> : vector<2xf32>
    %47 = vector.multi_reduction <add>, %8, %cst_25 [1] : vector<2x256xf32> to vector<2xf32>
    %48 = vector.shape_cast %47 : vector<2xf32> to vector<2x1xf32>
    %cst_26 = arith.constant 3.906250e-03 : f32
    %49 = vector.broadcast %cst_26 : f32 to vector<2x1xf32>
    %50 = arith.mulf %48, %49 : vector<2x1xf32>
    %cst_27 = arith.constant dense<0.000000e+00> : vector<2xf32>
    %51 = vector.multi_reduction <add>, %10, %cst_27 [1] : vector<2x256xf32> to vector<2xf32>
    %52 = vector.shape_cast %51 : vector<2xf32> to vector<2x1xf32>
    %cst_28 = arith.constant 3.906250e-03 : f32
    %53 = vector.broadcast %cst_28 : f32 to vector<2x1xf32>
    %54 = arith.mulf %52, %53 : vector<2x1xf32>
    %55 = vector.broadcast %50 : vector<2x1xf32> to vector<2x256xf32>
    %56 = arith.subf %8, %55 : vector<2x256xf32>
    %57 = vector.broadcast %54 : vector<2x1xf32> to vector<2x256xf32>
    %58 = arith.subf %10, %57 : vector<2x256xf32>
    %59 = arith.mulf %56, %58 : vector<2x256xf32>
    %cst_29 = arith.constant dense<0.000000e+00> : vector<2xf32>
    %60 = vector.multi_reduction <add>, %59, %cst_29 [1] : vector<2x256xf32> to vector<2xf32>
    %61 = vector.shape_cast %60 : vector<2xf32> to vector<2x1xf32>
    %62 = arith.mulf %56, %56 : vector<2x256xf32>
    %cst_30 = arith.constant dense<0.000000e+00> : vector<2xf32>
    %63 = vector.multi_reduction <add>, %62, %cst_30 [1] : vector<2x256xf32> to vector<2xf32>
    %64 = vector.shape_cast %63 : vector<2xf32> to vector<2x1xf32>
    %65 = arith.mulf %58, %58 : vector<2x256xf32>
    %cst_31 = arith.constant dense<0.000000e+00> : vector<2xf32>
    %66 = vector.multi_reduction <add>, %65, %cst_31 [1] : vector<2x256xf32> to vector<2xf32>
    %67 = vector.shape_cast %66 : vector<2xf32> to vector<2x1xf32>
    %68 = arith.mulf %64, %67 : vector<2x1xf32>
    %69 = math.sqrt %68 : vector<2x1xf32>
    %cst_32 = arith.constant 1.1920929E-7 : f32
    %70 = vector.broadcast %cst_32 : f32 to vector<2x1xf32>
    %71 = arith.addf %70, %69 : vector<2x1xf32>
    %72 = tpu.reciprocal %71 {approx = true} : vector<2x1xf32> -> vector<2x1xf32>
    %73 = arith.mulf %61, %72 : vector<2x1xf32>
    %cst_33 = arith.constant -1.000000e+00 : f32
    %cst_34 = arith.constant 1.000000e+00 : f32
    %74 = vector.broadcast %cst_33 : f32 to vector<2x1xf32>
    %75 = arith.maximumf %74, %73 : vector<2x1xf32>
    %76 = vector.broadcast %cst_34 : f32 to vector<2x1xf32>
    %77 = arith.minimumf %76, %75 : vector<2x1xf32>
    %78 = vector.shape_cast %77 : vector<2x1xf32> to vector<1x2x1xf32>
    %cst_35 = arith.constant dense<0.000000e+00> : vector<1xf32>
    %79 = vector.multi_reduction <add>, %78, %cst_35 [1, 2] : vector<1x2x1xf32> to vector<1xf32>
    %80 = vector.shape_cast %79 : vector<1xf32> to vector<1x1x1xf32>
    %81 = vector.extract %80[0, 0, 0] : f32 from vector<1x1x1xf32>
    %cst_36 = arith.constant 0.000000e+00 : f32
    %82 = arith.addf %cst_36, %81 : f32
    %83 = arith.mulf %4, %4 : vector<2x256xf32>
    %cst_37 = arith.constant dense<0.000000e+00> : vector<2xf32>
    %84 = vector.multi_reduction <add>, %83, %cst_37 [1] : vector<2x256xf32> to vector<2xf32>
    %85 = vector.shape_cast %84 : vector<2xf32> to vector<2x1xf32>
    %86 = arith.addf %0, %85 : vector<2x1xf32>
    %87 = arith.mulf %6, %6 : vector<2x256xf32>
    %cst_38 = arith.constant dense<0.000000e+00> : vector<2xf32>
    %88 = vector.multi_reduction <add>, %87, %cst_38 [1] : vector<2x256xf32> to vector<2xf32>
    %89 = vector.shape_cast %88 : vector<2xf32> to vector<2x1xf32>
    %90 = arith.addf %1, %89 : vector<2x1xf32>
    %cst_39 = arith.constant dense<0.000000e+00> : vector<2x2xf32>
    %91 = tpu.matmul %4, %6, %cst_39 {dimension_numbers = #tpu.dot_dimension_numbers<[1], [1], [0], [0], [0, 0, 1, 0], [], []>} : vector<2x256xf32>, vector<2x256xf32>, vector<2x2xf32> -> vector<2x2xf32>
    %92 = arith.addf %2, %91 : vector<2x2xf32>
    %c0_40 = arith.constant 0 : index
    %c1 = arith.constant 1 : index
    %c0_41 = arith.constant 0 : index
    %93 = vector.load %arg1[%c0_40, %c1, %c0_41] : memref<2x4x256xf32, #tpu.memory_space<vmem>>, vector<2x1x256xf32>
    %94 = vector.shape_cast %93 : vector<2x1x256xf32> to vector<2x256xf32>
    %c0_42 = arith.constant 0 : index
    %c1_43 = arith.constant 1 : index
    %c0_44 = arith.constant 0 : index
    %95 = vector.load %arg2[%c0_42, %c1_43, %c0_44] : memref<2x4x256xf32, #tpu.memory_space<vmem>>, vector<2x1x256xf32>
    %96 = vector.shape_cast %95 : vector<2x1x256xf32> to vector<2x256xf32>
    %c0_45 = arith.constant 0 : index
    %c1_46 = arith.constant 1 : index
    %c0_47 = arith.constant 0 : index
    %97 = vector.load %arg3[%c0_45, %c1_46, %c0_47] : memref<2x4x256xf32, #tpu.memory_space<vmem>>, vector<2x1x256xf32>
    %98 = vector.shape_cast %97 : vector<2x1x256xf32> to vector<2x256xf32>
    %c0_48 = arith.constant 0 : index
    %c1_49 = arith.constant 1 : index
    %c0_50 = arith.constant 0 : index
    %99 = vector.load %arg4[%c0_48, %c1_49, %c0_50] : memref<2x4x256xf32, #tpu.memory_space<vmem>>, vector<2x1x256xf32>
    %100 = vector.shape_cast %99 : vector<2x1x256xf32> to vector<2x256xf32>
    %cst_51 = arith.constant dense<0.000000e+00> : vector<2xf32>
    %101 = vector.multi_reduction <add>, %94, %cst_51 [1] : vector<2x256xf32> to vector<2xf32>
    %102 = vector.shape_cast %101 : vector<2xf32> to vector<2x1xf32>
    %cst_52 = arith.constant 3.906250e-03 : f32
    %103 = vector.broadcast %cst_52 : f32 to vector<2x1xf32>
    %104 = arith.mulf %102, %103 : vector<2x1xf32>
    %cst_53 = arith.constant dense<0.000000e+00> : vector<2xf32>
    %105 = vector.multi_reduction <add>, %96, %cst_53 [1] : vector<2x256xf32> to vector<2xf32>
    %106 = vector.shape_cast %105 : vector<2xf32> to vector<2x1xf32>
    %cst_54 = arith.constant 3.906250e-03 : f32
    %107 = vector.broadcast %cst_54 : f32 to vector<2x1xf32>
    %108 = arith.mulf %106, %107 : vector<2x1xf32>
    %109 = vector.broadcast %104 : vector<2x1xf32> to vector<2x256xf32>
    %110 = arith.subf %94, %109 : vector<2x256xf32>
    %111 = vector.broadcast %108 : vector<2x1xf32> to vector<2x256xf32>
    %112 = arith.subf %96, %111 : vector<2x256xf32>
    %113 = arith.mulf %110, %112 : vector<2x256xf32>
    %cst_55 = arith.constant dense<0.000000e+00> : vector<2xf32>
    %114 = vector.multi_reduction <add>, %113, %cst_55 [1] : vector<2x256xf32> to vector<2xf32>
    %115 = vector.shape_cast %114 : vector<2xf32> to vector<2x1xf32>
    %116 = arith.mulf %110, %110 : vector<2x256xf32>
    %cst_56 = arith.constant dense<0.000000e+00> : vector<2xf32>
    %117 = vector.multi_reduction <add>, %116, %cst_56 [1] : vector<2x256xf32> to vector<2xf32>
    %118 = vector.shape_cast %117 : vector<2xf32> to vector<2x1xf32>
    %119 = arith.mulf %112, %112 : vector<2x256xf32>
    %cst_57 = arith.constant dense<0.000000e+00> : vector<2xf32>
    %120 = vector.multi_reduction <add>, %119, %cst_57 [1] : vector<2x256xf32> to vector<2xf32>
    %121 = vector.shape_cast %120 : vector<2xf32> to vector<2x1xf32>
    %122 = arith.mulf %118, %121 : vector<2x1xf32>
    %123 = math.sqrt %122 : vector<2x1xf32>
    %cst_58 = arith.constant 1.1920929E-7 : f32
    %124 = vector.broadcast %cst_58 : f32 to vector<2x1xf32>
    %125 = arith.addf %124, %123 : vector<2x1xf32>
    %126 = tpu.reciprocal %125 {approx = true} : vector<2x1xf32> -> vector<2x1xf32>
    %127 = arith.mulf %115, %126 : vector<2x1xf32>
    %cst_59 = arith.constant -1.000000e+00 : f32
    %cst_60 = arith.constant 1.000000e+00 : f32
    %128 = vector.broadcast %cst_59 : f32 to vector<2x1xf32>
    %129 = arith.maximumf %128, %127 : vector<2x1xf32>
    %130 = vector.broadcast %cst_60 : f32 to vector<2x1xf32>
    %131 = arith.minimumf %130, %129 : vector<2x1xf32>
    %132 = vector.shape_cast %131 : vector<2x1xf32> to vector<1x2x1xf32>
    %cst_61 = arith.constant dense<0.000000e+00> : vector<1xf32>
    %133 = vector.multi_reduction <add>, %132, %cst_61 [1, 2] : vector<1x2x1xf32> to vector<1xf32>
    %134 = vector.shape_cast %133 : vector<1xf32> to vector<1x1x1xf32>
    %135 = vector.extract %134[0, 0, 0] : f32 from vector<1x1x1xf32>
    %136 = arith.addf %46, %135 : f32
    %cst_62 = arith.constant dense<0.000000e+00> : vector<2xf32>
    %137 = vector.multi_reduction <add>, %98, %cst_62 [1] : vector<2x256xf32> to vector<2xf32>
    %138 = vector.shape_cast %137 : vector<2xf32> to vector<2x1xf32>
    %cst_63 = arith.constant 3.906250e-03 : f32
    %139 = vector.broadcast %cst_63 : f32 to vector<2x1xf32>
    %140 = arith.mulf %138, %139 : vector<2x1xf32>
    %cst_64 = arith.constant dense<0.000000e+00> : vector<2xf32>
    %141 = vector.multi_reduction <add>, %100, %cst_64 [1] : vector<2x256xf32> to vector<2xf32>
    %142 = vector.shape_cast %141 : vector<2xf32> to vector<2x1xf32>
    %cst_65 = arith.constant 3.906250e-03 : f32
    %143 = vector.broadcast %cst_65 : f32 to vector<2x1xf32>
    %144 = arith.mulf %142, %143 : vector<2x1xf32>
    %145 = vector.broadcast %140 : vector<2x1xf32> to vector<2x256xf32>
    %146 = arith.subf %98, %145 : vector<2x256xf32>
    %147 = vector.broadcast %144 : vector<2x1xf32> to vector<2x256xf32>
    %148 = arith.subf %100, %147 : vector<2x256xf32>
    %149 = arith.mulf %146, %148 : vector<2x256xf32>
    %cst_66 = arith.constant dense<0.000000e+00> : vector<2xf32>
    %150 = vector.multi_reduction <add>, %149, %cst_66 [1] : vector<2x256xf32> to vector<2xf32>
    %151 = vector.shape_cast %150 : vector<2xf32> to vector<2x1xf32>
    %152 = arith.mulf %146, %146 : vector<2x256xf32>
    %cst_67 = arith.constant dense<0.000000e+00> : vector<2xf32>
    %153 = vector.multi_reduction <add>, %152, %cst_67 [1] : vector<2x256xf32> to vector<2xf32>
    %154 = vector.shape_cast %153 : vector<2xf32> to vector<2x1xf32>
    %155 = arith.mulf %148, %148 : vector<2x256xf32>
    %cst_68 = arith.constant dense<0.000000e+00> : vector<2xf32>
    %156 = vector.multi_reduction <add>, %155, %cst_68 [1] : vector<2x256xf32> to vector<2xf32>
    %157 = vector.shape_cast %156 : vector<2xf32> to vector<2x1xf32>
    %158 = arith.mulf %154, %157 : vector<2x1xf32>
    %159 = math.sqrt %158 : vector<2x1xf32>
    %cst_69 = arith.constant 1.1920929E-7 : f32
    %160 = vector.broadcast %cst_69 : f32 to vector<2x1xf32>
    %161 = arith.addf %160, %159 : vector<2x1xf32>
    %162 = tpu.reciprocal %161 {approx = true} : vector<2x1xf32> -> vector<2x1xf32>
    %163 = arith.mulf %151, %162 : vector<2x1xf32>
    %cst_70 = arith.constant -1.000000e+00 : f32
    %cst_71 = arith.constant 1.000000e+00 : f32
    %164 = vector.broadcast %cst_70 : f32 to vector<2x1xf32>
    %165 = arith.maximumf %164, %163 : vector<2x1xf32>
    %166 = vector.broadcast %cst_71 : f32 to vector<2x1xf32>
    %167 = arith.minimumf %166, %165 : vector<2x1xf32>
    %168 = vector.shape_cast %167 : vector<2x1xf32> to vector<1x2x1xf32>
    %cst_72 = arith.constant dense<0.000000e+00> : vector<1xf32>
    %169 = vector.multi_reduction <add>, %168, %cst_72 [1, 2] : vector<1x2x1xf32> to vector<1xf32>
    %170 = vector.shape_cast %169 : vector<1xf32> to vector<1x1x1xf32>
    %171 = vector.extract %170[0, 0, 0] : f32 from vector<1x1x1xf32>
    %172 = arith.addf %82, %171 : f32
    %173 = arith.mulf %94, %94 : vector<2x256xf32>
    %cst_73 = arith.constant dense<0.000000e+00> : vector<2xf32>
    %174 = vector.multi_reduction <add>, %173, %cst_73 [1] : vector<2x256xf32> to vector<2xf32>
    %175 = vector.shape_cast %174 : vector<2xf32> to vector<2x1xf32>
    %176 = arith.addf %86, %175 : vector<2x1xf32>
    %177 = arith.mulf %96, %96 : vector<2x256xf32>
    %cst_74 = arith.constant dense<0.000000e+00> : vector<2xf32>
    %178 = vector.multi_reduction <add>, %177, %cst_74 [1] : vector<2x256xf32> to vector<2xf32>
    %179 = vector.shape_cast %178 : vector<2xf32> to vector<2x1xf32>
    %180 = arith.addf %90, %179 : vector<2x1xf32>
    %cst_75 = arith.constant dense<0.000000e+00> : vector<2x2xf32>
    %181 = tpu.matmul %94, %96, %cst_75 {dimension_numbers = #tpu.dot_dimension_numbers<[1], [1], [0], [0], [0, 0, 1, 0], [], []>} : vector<2x256xf32>, vector<2x256xf32>, vector<2x2xf32> -> vector<2x2xf32>
    %182 = arith.addf %92, %181 : vector<2x2xf32>
    %c0_76 = arith.constant 0 : index
    %c2 = arith.constant 2 : index
    %c0_77 = arith.constant 0 : index
    %183 = vector.load %arg1[%c0_76, %c2, %c0_77] : memref<2x4x256xf32, #tpu.memory_space<vmem>>, vector<2x1x256xf32>
    %184 = vector.shape_cast %183 : vector<2x1x256xf32> to vector<2x256xf32>
    %c0_78 = arith.constant 0 : index
    %c2_79 = arith.constant 2 : index
    %c0_80 = arith.constant 0 : index
    %185 = vector.load %arg2[%c0_78, %c2_79, %c0_80] : memref<2x4x256xf32, #tpu.memory_space<vmem>>, vector<2x1x256xf32>
    %186 = vector.shape_cast %185 : vector<2x1x256xf32> to vector<2x256xf32>
    %c0_81 = arith.constant 0 : index
    %c2_82 = arith.constant 2 : index
    %c0_83 = arith.constant 0 : index
    %187 = vector.load %arg3[%c0_81, %c2_82, %c0_83] : memref<2x4x256xf32, #tpu.memory_space<vmem>>, vector<2x1x256xf32>
    %188 = vector.shape_cast %187 : vector<2x1x256xf32> to vector<2x256xf32>
    %c0_84 = arith.constant 0 : index
    %c2_85 = arith.constant 2 : index
    %c0_86 = arith.constant 0 : index
    %189 = vector.load %arg4[%c0_84, %c2_85, %c0_86] : memref<2x4x256xf32, #tpu.memory_space<vmem>>, vector<2x1x256xf32>
    %190 = vector.shape_cast %189 : vector<2x1x256xf32> to vector<2x256xf32>
    %cst_87 = arith.constant dense<0.000000e+00> : vector<2xf32>
    %191 = vector.multi_reduction <add>, %184, %cst_87 [1] : vector<2x256xf32> to vector<2xf32>
    %192 = vector.shape_cast %191 : vector<2xf32> to vector<2x1xf32>
    %cst_88 = arith.constant 3.906250e-03 : f32
    %193 = vector.broadcast %cst_88 : f32 to vector<2x1xf32>
    %194 = arith.mulf %192, %193 : vector<2x1xf32>
    %cst_89 = arith.constant dense<0.000000e+00> : vector<2xf32>
    %195 = vector.multi_reduction <add>, %186, %cst_89 [1] : vector<2x256xf32> to vector<2xf32>
    %196 = vector.shape_cast %195 : vector<2xf32> to vector<2x1xf32>
    %cst_90 = arith.constant 3.906250e-03 : f32
    %197 = vector.broadcast %cst_90 : f32 to vector<2x1xf32>
    %198 = arith.mulf %196, %197 : vector<2x1xf32>
    %199 = vector.broadcast %194 : vector<2x1xf32> to vector<2x256xf32>
    %200 = arith.subf %184, %199 : vector<2x256xf32>
    %201 = vector.broadcast %198 : vector<2x1xf32> to vector<2x256xf32>
    %202 = arith.subf %186, %201 : vector<2x256xf32>
    %203 = arith.mulf %200, %202 : vector<2x256xf32>
    %cst_91 = arith.constant dense<0.000000e+00> : vector<2xf32>
    %204 = vector.multi_reduction <add>, %203, %cst_91 [1] : vector<2x256xf32> to vector<2xf32>
    %205 = vector.shape_cast %204 : vector<2xf32> to vector<2x1xf32>
    %206 = arith.mulf %200, %200 : vector<2x256xf32>
    %cst_92 = arith.constant dense<0.000000e+00> : vector<2xf32>
    %207 = vector.multi_reduction <add>, %206, %cst_92 [1] : vector<2x256xf32> to vector<2xf32>
    %208 = vector.shape_cast %207 : vector<2xf32> to vector<2x1xf32>
    %209 = arith.mulf %202, %202 : vector<2x256xf32>
    %cst_93 = arith.constant dense<0.000000e+00> : vector<2xf32>
    %210 = vector.multi_reduction <add>, %209, %cst_93 [1] : vector<2x256xf32> to vector<2xf32>
    %211 = vector.shape_cast %210 : vector<2xf32> to vector<2x1xf32>
    %212 = arith.mulf %208, %211 : vector<2x1xf32>
    %213 = math.sqrt %212 : vector<2x1xf32>
    %cst_94 = arith.constant 1.1920929E-7 : f32
    %214 = vector.broadcast %cst_94 : f32 to vector<2x1xf32>
    %215 = arith.addf %214, %213 : vector<2x1xf32>
    %216 = tpu.reciprocal %215 {approx = true} : vector<2x1xf32> -> vector<2x1xf32>
    %217 = arith.mulf %205, %216 : vector<2x1xf32>
    %cst_95 = arith.constant -1.000000e+00 : f32
    %cst_96 = arith.constant 1.000000e+00 : f32
    %218 = vector.broadcast %cst_95 : f32 to vector<2x1xf32>
    %219 = arith.maximumf %218, %217 : vector<2x1xf32>
    %220 = vector.broadcast %cst_96 : f32 to vector<2x1xf32>
    %221 = arith.minimumf %220, %219 : vector<2x1xf32>
    %222 = vector.shape_cast %221 : vector<2x1xf32> to vector<1x2x1xf32>
    %cst_97 = arith.constant dense<0.000000e+00> : vector<1xf32>
    %223 = vector.multi_reduction <add>, %222, %cst_97 [1, 2] : vector<1x2x1xf32> to vector<1xf32>
    %224 = vector.shape_cast %223 : vector<1xf32> to vector<1x1x1xf32>
    %225 = vector.extract %224[0, 0, 0] : f32 from vector<1x1x1xf32>
    %226 = arith.addf %136, %225 : f32
    %cst_98 = arith.constant dense<0.000000e+00> : vector<2xf32>
    %227 = vector.multi_reduction <add>, %188, %cst_98 [1] : vector<2x256xf32> to vector<2xf32>
    %228 = vector.shape_cast %227 : vector<2xf32> to vector<2x1xf32>
    %cst_99 = arith.constant 3.906250e-03 : f32
    %229 = vector.broadcast %cst_99 : f32 to vector<2x1xf32>
    %230 = arith.mulf %228, %229 : vector<2x1xf32>
    %cst_100 = arith.constant dense<0.000000e+00> : vector<2xf32>
    %231 = vector.multi_reduction <add>, %190, %cst_100 [1] : vector<2x256xf32> to vector<2xf32>
    %232 = vector.shape_cast %231 : vector<2xf32> to vector<2x1xf32>
    %cst_101 = arith.constant 3.906250e-03 : f32
    %233 = vector.broadcast %cst_101 : f32 to vector<2x1xf32>
    %234 = arith.mulf %232, %233 : vector<2x1xf32>
    %235 = vector.broadcast %230 : vector<2x1xf32> to vector<2x256xf32>
    %236 = arith.subf %188, %235 : vector<2x256xf32>
    %237 = vector.broadcast %234 : vector<2x1xf32> to vector<2x256xf32>
    %238 = arith.subf %190, %237 : vector<2x256xf32>
    %239 = arith.mulf %236, %238 : vector<2x256xf32>
    %cst_102 = arith.constant dense<0.000000e+00> : vector<2xf32>
    %240 = vector.multi_reduction <add>, %239, %cst_102 [1] : vector<2x256xf32> to vector<2xf32>
    %241 = vector.shape_cast %240 : vector<2xf32> to vector<2x1xf32>
    %242 = arith.mulf %236, %236 : vector<2x256xf32>
    %cst_103 = arith.constant dense<0.000000e+00> : vector<2xf32>
    %243 = vector.multi_reduction <add>, %242, %cst_103 [1] : vector<2x256xf32> to vector<2xf32>
    %244 = vector.shape_cast %243 : vector<2xf32> to vector<2x1xf32>
    %245 = arith.mulf %238, %238 : vector<2x256xf32>
    %cst_104 = arith.constant dense<0.000000e+00> : vector<2xf32>
    %246 = vector.multi_reduction <add>, %245, %cst_104 [1] : vector<2x256xf32> to vector<2xf32>
    %247 = vector.shape_cast %246 : vector<2xf32> to vector<2x1xf32>
    %248 = arith.mulf %244, %247 : vector<2x1xf32>
    %249 = math.sqrt %248 : vector<2x1xf32>
    %cst_105 = arith.constant 1.1920929E-7 : f32
    %250 = vector.broadcast %cst_105 : f32 to vector<2x1xf32>
    %251 = arith.addf %250, %249 : vector<2x1xf32>
    %252 = tpu.reciprocal %251 {approx = true} : vector<2x1xf32> -> vector<2x1xf32>
    %253 = arith.mulf %241, %252 : vector<2x1xf32>
    %cst_106 = arith.constant -1.000000e+00 : f32
    %cst_107 = arith.constant 1.000000e+00 : f32
    %254 = vector.broadcast %cst_106 : f32 to vector<2x1xf32>
    %255 = arith.maximumf %254, %253 : vector<2x1xf32>
    %256 = vector.broadcast %cst_107 : f32 to vector<2x1xf32>
    %257 = arith.minimumf %256, %255 : vector<2x1xf32>
    %258 = vector.shape_cast %257 : vector<2x1xf32> to vector<1x2x1xf32>
    %cst_108 = arith.constant dense<0.000000e+00> : vector<1xf32>
    %259 = vector.multi_reduction <add>, %258, %cst_108 [1, 2] : vector<1x2x1xf32> to vector<1xf32>
    %260 = vector.shape_cast %259 : vector<1xf32> to vector<1x1x1xf32>
    %261 = vector.extract %260[0, 0, 0] : f32 from vector<1x1x1xf32>
    %262 = arith.addf %172, %261 : f32
    %263 = arith.mulf %184, %184 : vector<2x256xf32>
    %cst_109 = arith.constant dense<0.000000e+00> : vector<2xf32>
    %264 = vector.multi_reduction <add>, %263, %cst_109 [1] : vector<2x256xf32> to vector<2xf32>
    %265 = vector.shape_cast %264 : vector<2xf32> to vector<2x1xf32>
    %266 = arith.addf %176, %265 : vector<2x1xf32>
    %267 = arith.mulf %186, %186 : vector<2x256xf32>
    %cst_110 = arith.constant dense<0.000000e+00> : vector<2xf32>
    %268 = vector.multi_reduction <add>, %267, %cst_110 [1] : vector<2x256xf32> to vector<2xf32>
    %269 = vector.shape_cast %268 : vector<2xf32> to vector<2x1xf32>
    %270 = arith.addf %180, %269 : vector<2x1xf32>
    %cst_111 = arith.constant dense<0.000000e+00> : vector<2x2xf32>
    %271 = tpu.matmul %184, %186, %cst_111 {dimension_numbers = #tpu.dot_dimension_numbers<[1], [1], [0], [0], [0, 0, 1, 0], [], []>} : vector<2x256xf32>, vector<2x256xf32>, vector<2x2xf32> -> vector<2x2xf32>
    %272 = arith.addf %182, %271 : vector<2x2xf32>
    %c0_112 = arith.constant 0 : index
    %c3 = arith.constant 3 : index
    %c0_113 = arith.constant 0 : index
    %273 = vector.load %arg1[%c0_112, %c3, %c0_113] : memref<2x4x256xf32, #tpu.memory_space<vmem>>, vector<2x1x256xf32>
    %274 = vector.shape_cast %273 : vector<2x1x256xf32> to vector<2x256xf32>
    %c0_114 = arith.constant 0 : index
    %c3_115 = arith.constant 3 : index
    %c0_116 = arith.constant 0 : index
    %275 = vector.load %arg2[%c0_114, %c3_115, %c0_116] : memref<2x4x256xf32, #tpu.memory_space<vmem>>, vector<2x1x256xf32>
    %276 = vector.shape_cast %275 : vector<2x1x256xf32> to vector<2x256xf32>
    %c0_117 = arith.constant 0 : index
    %c3_118 = arith.constant 3 : index
    %c0_119 = arith.constant 0 : index
    %277 = vector.load %arg3[%c0_117, %c3_118, %c0_119] : memref<2x4x256xf32, #tpu.memory_space<vmem>>, vector<2x1x256xf32>
    %278 = vector.shape_cast %277 : vector<2x1x256xf32> to vector<2x256xf32>
    %c0_120 = arith.constant 0 : index
    %c3_121 = arith.constant 3 : index
    %c0_122 = arith.constant 0 : index
    %279 = vector.load %arg4[%c0_120, %c3_121, %c0_122] : memref<2x4x256xf32, #tpu.memory_space<vmem>>, vector<2x1x256xf32>
    %280 = vector.shape_cast %279 : vector<2x1x256xf32> to vector<2x256xf32>
    %cst_123 = arith.constant dense<0.000000e+00> : vector<2xf32>
    %281 = vector.multi_reduction <add>, %274, %cst_123 [1] : vector<2x256xf32> to vector<2xf32>
    %282 = vector.shape_cast %281 : vector<2xf32> to vector<2x1xf32>
    %cst_124 = arith.constant 3.906250e-03 : f32
    %283 = vector.broadcast %cst_124 : f32 to vector<2x1xf32>
    %284 = arith.mulf %282, %283 : vector<2x1xf32>
    %cst_125 = arith.constant dense<0.000000e+00> : vector<2xf32>
    %285 = vector.multi_reduction <add>, %276, %cst_125 [1] : vector<2x256xf32> to vector<2xf32>
    %286 = vector.shape_cast %285 : vector<2xf32> to vector<2x1xf32>
    %cst_126 = arith.constant 3.906250e-03 : f32
    %287 = vector.broadcast %cst_126 : f32 to vector<2x1xf32>
    %288 = arith.mulf %286, %287 : vector<2x1xf32>
    %289 = vector.broadcast %284 : vector<2x1xf32> to vector<2x256xf32>
    %290 = arith.subf %274, %289 : vector<2x256xf32>
    %291 = vector.broadcast %288 : vector<2x1xf32> to vector<2x256xf32>
    %292 = arith.subf %276, %291 : vector<2x256xf32>
    %293 = arith.mulf %290, %292 : vector<2x256xf32>
    %cst_127 = arith.constant dense<0.000000e+00> : vector<2xf32>
    %294 = vector.multi_reduction <add>, %293, %cst_127 [1] : vector<2x256xf32> to vector<2xf32>
    %295 = vector.shape_cast %294 : vector<2xf32> to vector<2x1xf32>
    %296 = arith.mulf %290, %290 : vector<2x256xf32>
    %cst_128 = arith.constant dense<0.000000e+00> : vector<2xf32>
    %297 = vector.multi_reduction <add>, %296, %cst_128 [1] : vector<2x256xf32> to vector<2xf32>
    %298 = vector.shape_cast %297 : vector<2xf32> to vector<2x1xf32>
    %299 = arith.mulf %292, %292 : vector<2x256xf32>
    %cst_129 = arith.constant dense<0.000000e+00> : vector<2xf32>
    %300 = vector.multi_reduction <add>, %299, %cst_129 [1] : vector<2x256xf32> to vector<2xf32>
    %301 = vector.shape_cast %300 : vector<2xf32> to vector<2x1xf32>
    %302 = arith.mulf %298, %301 : vector<2x1xf32>
    %303 = math.sqrt %302 : vector<2x1xf32>
    %cst_130 = arith.constant 1.1920929E-7 : f32
    %304 = vector.broadcast %cst_130 : f32 to vector<2x1xf32>
    %305 = arith.addf %304, %303 : vector<2x1xf32>
    %306 = tpu.reciprocal %305 {approx = true} : vector<2x1xf32> -> vector<2x1xf32>
    %307 = arith.mulf %295, %306 : vector<2x1xf32>
    %cst_131 = arith.constant -1.000000e+00 : f32
    %cst_132 = arith.constant 1.000000e+00 : f32
    %308 = vector.broadcast %cst_131 : f32 to vector<2x1xf32>
    %309 = arith.maximumf %308, %307 : vector<2x1xf32>
    %310 = vector.broadcast %cst_132 : f32 to vector<2x1xf32>
    %311 = arith.minimumf %310, %309 : vector<2x1xf32>
    %312 = vector.shape_cast %311 : vector<2x1xf32> to vector<1x2x1xf32>
    %cst_133 = arith.constant dense<0.000000e+00> : vector<1xf32>
    %313 = vector.multi_reduction <add>, %312, %cst_133 [1, 2] : vector<1x2x1xf32> to vector<1xf32>
    %314 = vector.shape_cast %313 : vector<1xf32> to vector<1x1x1xf32>
    %315 = vector.extract %314[0, 0, 0] : f32 from vector<1x1x1xf32>
    %316 = arith.addf %226, %315 : f32
    %cst_134 = arith.constant dense<0.000000e+00> : vector<2xf32>
    %317 = vector.multi_reduction <add>, %278, %cst_134 [1] : vector<2x256xf32> to vector<2xf32>
    %318 = vector.shape_cast %317 : vector<2xf32> to vector<2x1xf32>
    %cst_135 = arith.constant 3.906250e-03 : f32
    %319 = vector.broadcast %cst_135 : f32 to vector<2x1xf32>
    %320 = arith.mulf %318, %319 : vector<2x1xf32>
    %cst_136 = arith.constant dense<0.000000e+00> : vector<2xf32>
    %321 = vector.multi_reduction <add>, %280, %cst_136 [1] : vector<2x256xf32> to vector<2xf32>
    %322 = vector.shape_cast %321 : vector<2xf32> to vector<2x1xf32>
    %cst_137 = arith.constant 3.906250e-03 : f32
    %323 = vector.broadcast %cst_137 : f32 to vector<2x1xf32>
    %324 = arith.mulf %322, %323 : vector<2x1xf32>
    %325 = vector.broadcast %320 : vector<2x1xf32> to vector<2x256xf32>
    %326 = arith.subf %278, %325 : vector<2x256xf32>
    %327 = vector.broadcast %324 : vector<2x1xf32> to vector<2x256xf32>
    %328 = arith.subf %280, %327 : vector<2x256xf32>
    %329 = arith.mulf %326, %328 : vector<2x256xf32>
    %cst_138 = arith.constant dense<0.000000e+00> : vector<2xf32>
    %330 = vector.multi_reduction <add>, %329, %cst_138 [1] : vector<2x256xf32> to vector<2xf32>
    %331 = vector.shape_cast %330 : vector<2xf32> to vector<2x1xf32>
    %332 = arith.mulf %326, %326 : vector<2x256xf32>
    %cst_139 = arith.constant dense<0.000000e+00> : vector<2xf32>
    %333 = vector.multi_reduction <add>, %332, %cst_139 [1] : vector<2x256xf32> to vector<2xf32>
    %334 = vector.shape_cast %333 : vector<2xf32> to vector<2x1xf32>
    %335 = arith.mulf %328, %328 : vector<2x256xf32>
    %cst_140 = arith.constant dense<0.000000e+00> : vector<2xf32>
    %336 = vector.multi_reduction <add>, %335, %cst_140 [1] : vector<2x256xf32> to vector<2xf32>
    %337 = vector.shape_cast %336 : vector<2xf32> to vector<2x1xf32>
    %338 = arith.mulf %334, %337 : vector<2x1xf32>
    %339 = math.sqrt %338 : vector<2x1xf32>
    %cst_141 = arith.constant 1.1920929E-7 : f32
    %340 = vector.broadcast %cst_141 : f32 to vector<2x1xf32>
    %341 = arith.addf %340, %339 : vector<2x1xf32>
    %342 = tpu.reciprocal %341 {approx = true} : vector<2x1xf32> -> vector<2x1xf32>
    %343 = arith.mulf %331, %342 : vector<2x1xf32>
    %cst_142 = arith.constant -1.000000e+00 : f32
    %cst_143 = arith.constant 1.000000e+00 : f32
    %344 = vector.broadcast %cst_142 : f32 to vector<2x1xf32>
    %345 = arith.maximumf %344, %343 : vector<2x1xf32>
    %346 = vector.broadcast %cst_143 : f32 to vector<2x1xf32>
    %347 = arith.minimumf %346, %345 : vector<2x1xf32>
    %348 = vector.shape_cast %347 : vector<2x1xf32> to vector<1x2x1xf32>
    %cst_144 = arith.constant dense<0.000000e+00> : vector<1xf32>
    %349 = vector.multi_reduction <add>, %348, %cst_144 [1, 2] : vector<1x2x1xf32> to vector<1xf32>
    %350 = vector.shape_cast %349 : vector<1xf32> to vector<1x1x1xf32>
    %351 = vector.extract %350[0, 0, 0] : f32 from vector<1x1x1xf32>
    %352 = arith.addf %262, %351 : f32
    %353 = arith.mulf %274, %274 : vector<2x256xf32>
    %cst_145 = arith.constant dense<0.000000e+00> : vector<2xf32>
    %354 = vector.multi_reduction <add>, %353, %cst_145 [1] : vector<2x256xf32> to vector<2xf32>
    %355 = vector.shape_cast %354 : vector<2xf32> to vector<2x1xf32>
    %356 = arith.addf %266, %355 : vector<2x1xf32>
    %357 = arith.mulf %276, %276 : vector<2x256xf32>
    %cst_146 = arith.constant dense<0.000000e+00> : vector<2xf32>
    %358 = vector.multi_reduction <add>, %357, %cst_146 [1] : vector<2x256xf32> to vector<2xf32>
    %359 = vector.shape_cast %358 : vector<2xf32> to vector<2x1xf32>
    %360 = arith.addf %270, %359 : vector<2x1xf32>
    %cst_147 = arith.constant dense<0.000000e+00> : vector<2x2xf32>
    %361 = tpu.matmul %274, %276, %cst_147 {dimension_numbers = #tpu.dot_dimension_numbers<[1], [1], [0], [0], [0, 0, 1, 0], [], []>} : vector<2x256xf32>, vector<2x256xf32>, vector<2x2xf32> -> vector<2x2xf32>
    %362 = arith.addf %272, %361 : vector<2x2xf32>
    %363 = vector.broadcast %316 : f32 to vector<1x1xf32>
    %c0_148 = arith.constant 0 : index
    %c0_149 = arith.constant 0 : index
    %c0_150 = arith.constant 0 : index
    %364 = vector.load %arg5[%c0_148, %c0_149, %c0_150] : memref<1x1x1xf32, #tpu.memory_space<vmem>>, vector<1x1x1xf32>
    %365 = vector.shape_cast %364 : vector<1x1x1xf32> to vector<1x1xf32>
    %366 = vector.shape_cast %363 : vector<1x1xf32> to vector<1x1x1xf32>
    tpu.vector_store %arg5[%c0_148, %c0_149, %c0_150], %366 {strides = array<i32>} : memref<1x1x1xf32, #tpu.memory_space<vmem>>, vector<1x1x1xf32>,
    %367 = vector.broadcast %352 : f32 to vector<1x1xf32>
    %c0_151 = arith.constant 0 : index
    %c0_152 = arith.constant 0 : index
    %c0_153 = arith.constant 0 : index
    %368 = vector.load %arg6[%c0_151, %c0_152, %c0_153] : memref<1x1x1xf32, #tpu.memory_space<vmem>>, vector<1x1x1xf32>
    %369 = vector.shape_cast %368 : vector<1x1x1xf32> to vector<1x1xf32>
    %370 = vector.shape_cast %367 : vector<1x1xf32> to vector<1x1x1xf32>
    tpu.vector_store %arg6[%c0_151, %c0_152, %c0_153], %370 {strides = array<i32>} : memref<1x1x1xf32, #tpu.memory_space<vmem>>, vector<1x1x1xf32>,
    %c0_154 = arith.constant 0 : index
    %c0_155 = arith.constant 0 : index
    %c0_156 = arith.constant 0 : index
    %371 = vector.load %arg7[%c0_154, %c0_155, %c0_156] : memref<1x2x1xf32, #tpu.memory_space<vmem>>, vector<1x2x1xf32>
    %372 = vector.shape_cast %371 : vector<1x2x1xf32> to vector<2x1xf32>
    %373 = vector.shape_cast %356 : vector<2x1xf32> to vector<1x2x1xf32>
    tpu.vector_store %arg7[%c0_154, %c0_155, %c0_156], %373 {strides = array<i32>} : memref<1x2x1xf32, #tpu.memory_space<vmem>>, vector<1x2x1xf32>,
    %c0_157 = arith.constant 0 : index
    %c0_158 = arith.constant 0 : index
    %c0_159 = arith.constant 0 : index
    %374 = vector.load %arg8[%c0_157, %c0_158, %c0_159] : memref<1x2x1xf32, #tpu.memory_space<vmem>>, vector<1x2x1xf32>
    %375 = vector.shape_cast %374 : vector<1x2x1xf32> to vector<2x1xf32>
    %376 = vector.shape_cast %360 : vector<2x1xf32> to vector<1x2x1xf32>
    tpu.vector_store %arg8[%c0_157, %c0_158, %c0_159], %376 {strides = array<i32>} : memref<1x2x1xf32, #tpu.memory_space<vmem>>, vector<1x2x1xf32>,
    %c0_160 = arith.constant 0 : index
    %c0_161 = arith.constant 0 : index
    %c0_162 = arith.constant 0 : index
    %377 = vector.load %arg9[%c0_160, %c0_161, %c0_162] : memref<1x2x2xf32, #tpu.memory_space<vmem>>, vector<1x2x2xf32>
    %378 = vector.shape_cast %377 : vector<1x2x2xf32> to vector<2x2xf32>
    %379 = vector.shape_cast %362 : vector<2x2xf32> to vector<1x2x2xf32>
    tpu.vector_store %arg9[%c0_160, %c0_161, %c0_162], %379 {strides = array<i32>} : memref<1x2x2xf32, #tpu.memory_space<vmem>>, vector<1x2x2xf32>,
    return
  }
  func.func @transform_0(%arg0: i32) -> (i32, i32, i32) {
    %c0_i32 = arith.constant 0 : i32
    %c0_i32_0 = arith.constant 0 : i32
    %c0_i32_1 = arith.constant 0 : i32
    return %c0_i32, %arg0, %c0_i32_0 : i32, i32, i32
  }
  func.func @transform_1(%arg0: i32) -> (i32, i32, i32) {
    %c0_i32 = arith.constant 0 : i32
    %c0_i32_0 = arith.constant 0 : i32
    %c0_i32_1 = arith.constant 0 : i32
    return %c0_i32, %arg0, %c0_i32_0 : i32, i32, i32
  }
  func.func @transform_2(%arg0: i32) -> (i32, i32, i32) {
    %c0_i32 = arith.constant 0 : i32
    %c0_i32_0 = arith.constant 0 : i32
    %c0_i32_1 = arith.constant 0 : i32
    return %c0_i32, %arg0, %c0_i32_0 : i32, i32, i32
  }
  func.func @transform_3(%arg0: i32) -> (i32, i32, i32) {
    %c0_i32 = arith.constant 0 : i32
    %c0_i32_0 = arith.constant 0 : i32
    %c0_i32_1 = arith.constant 0 : i32
    return %c0_i32, %arg0, %c0_i32_0 : i32, i32, i32
  }
  func.func @transform_4(%arg0: i32) -> (i32, i32, i32) {
    %c0_i32 = arith.constant 0 : i32
    %c0_i32_0 = arith.constant 0 : i32
    %c0_i32_1 = arith.constant 0 : i32
    return %arg0, %c0_i32, %c0_i32_0 : i32, i32, i32
  }
  func.func @transform_5(%arg0: i32) -> (i32, i32, i32) {
    %c0_i32 = arith.constant 0 : i32
    %c0_i32_0 = arith.constant 0 : i32
    %c0_i32_1 = arith.constant 0 : i32
    return %arg0, %c0_i32, %c0_i32_0 : i32, i32, i32
  }
  func.func @transform_6(%arg0: i32) -> (i32, i32, i32) {
    %c0_i32 = arith.constant 0 : i32
    %c0_i32_0 = arith.constant 0 : i32
    %c0_i32_1 = arith.constant 0 : i32
    return %arg0, %c0_i32, %c0_i32_0 : i32, i32, i32
  }
  func.func @transform_7(%arg0: i32) -> (i32, i32, i32) {
    %c0_i32 = arith.constant 0 : i32
    %c0_i32_0 = arith.constant 0 : i32
    %c0_i32_1 = arith.constant 0 : i32
    return %arg0, %c0_i32, %c0_i32_0 : i32, i32, i32
  }
  func.func @transform_8(%arg0: i32) -> (i32, i32, i32) {
    %c0_i32 = arith.constant 0 : i32
    %c0_i32_0 = arith.constant 0 : i32
    %c0_i32_1 = arith.constant 0 : i32
    return %arg0, %c0_i32, %c0_i32_0 : i32, i32, i32
  }
}

</mosaic_0001>

<bundles_post_ra>
// kernel: tpu_custom_call.1
= control target key start
LH: loop header
LB: loop body
LE: loop exit
PB: predicated region body
PF: predicated region fallthrough
CT: control target
= control target key end

     0   :  { %14 = vsyncpa [#allocation3], 0  ;;  %s3542_s0 = inlined_call_operand.hbm [shape: f32[2,4,256], index: 0, kind: input, shape index: {}]   ;;  %s3543_s1 = inlined_call_operand.hbm [shape: f32[2,4,256], index: 1, kind: input, shape index: {}]   ;;  %s3544_s2 = inlined_call_operand.hbm [shape: f32[2,4,256], index: 2, kind: input, shape index: {}]   ;;  %s3545_s3 = inlined_call_operand.hbm [shape: f32[2,4,256], index: 3, kind: input, shape index: {}]   ;;  %s3546_s4 = inlined_call_operand.hbm [shape: f32[1,1,1], index: 4, kind: output, shape index: {0}]   ;;  %s3547_s5 = inlined_call_operand.hbm [shape: f32[1,1,1], index: 5, kind: output, shape index: {1}]   ;;  %s3548_s6 = inlined_call_operand.vmem [shape: f32[1,2,1], index: 6, kind: output, shape index: {2}]   ;;  %s3549_s7 = inlined_call_operand.vmem [shape: f32[1,2,1], index: 7, kind: output, shape index: {3}]   ;;  %s3550_s8 = inlined_call_operand.hbm [shape: f32[1,2,2], index: 8, kind: output, shape index: {4}]  }
   0x1   :  { %15 = vsyncpa [#allocation6], 0 }
   0x2   :  { %16 = vsyncpa [#allocation9], 0 }
   0x3   :  { %17 = vsyncpa [#allocation4], 0 }
   0x4   :  { %18 = vsyncpa [#allocation12], 0  ;;  %s2759_s27 = smov [#allocation5]   ;;  %s2760_s29 = smov [#allocation2]  }
   0x5   :  { %s36_s28 = sshll.u32 %s2759_s27, 4  ;;  %s24_s30 = sshll.u32 %s2760_s29, 4  ;;  %s37_s28 = int_to_ptr.vmem [resolvable:$true] %s36_s28  ;;  %s2814_s30 = int_to_ptr.vmem [resolvable:$true] %s24_s30 }
   0x6   :  { %s2595_s11 = scalar_lea.hbm %s3543_s1, 256 }
   0x7   :  { %p2596_p0 = scmp.ne.s32.totalorder %s3543_s1, %s2595_s11  ;;  %p2599_p1 = scmp.lt.u32.totalorder %s2595_s11, %s3543_s1 }
   0x9   :  { %p2601_p2 = pnand %p2599_p1, %p2596_p0 }
   0xb   :  { %2604 = shalt.err (!%p2601_p2)
}
   0xc   :  { %s2605_s16 = scalar_lea.vmem %s37_s28, 256  ;;  %p2610_p4 = scmp.lt.s32.totalorder %s37_s28, %s37_s28 }
   0xd   :  { %p2606_p3 = scmp.ne.s32.totalorder %s37_s28, %s2605_s16  ;;  %p2611_p5 = scmp.lt.s32.totalorder %s2605_s16, %s2605_s16 }
   0xf   :  { %p2612_p6 = por %p2611_p5, %p2610_p4 }
  0x11   :  { %p2613_p7 = pnand %p2612_p6, %p2606_p3 }
  0x13   :  { %2616 = shalt.err (!%p2613_p7)
}
  0x14   :  { %s2761_s17 = smov 128   ;;  %s2762_s18 = smov 8  }
  0x15   :  { %42 = dma.hbm_to_vmem [thread:$0]  %s3543_s1, 256, %s37_s28, [#allocation6], %s2761_s17, %s2761_s17, %s2762_s18  }
  0x16   :  { %s2617_s23 = scalar_lea.hbm %s3542_s0, 256 }
  0x17   :  { %p2618_p8 = scmp.ne.s32.totalorder %s3542_s0, %s2617_s23  ;;  %p2621_p9 = scmp.lt.u32.totalorder %s2617_s23, %s3542_s0 }
  0x19   :  { %p2623_p10 = pnand %p2621_p9, %p2618_p8 }
  0x1b   :  { %2626 = shalt.err (!%p2623_p10)
}
  0x1c   :  { %s2627_s29 = scalar_lea.vmem %s2814_s30, 256  ;;  %p2632_p12 = scmp.lt.s32.totalorder %s2814_s30, %s2814_s30 }
  0x1d   :  { %p2628_p11 = scmp.ne.s32.totalorder %s2814_s30, %s2627_s29  ;;  %p2633_p13 = scmp.lt.s32.totalorder %s2627_s29, %s2627_s29 }
  0x1f   :  { %p2634_p0 = por %p2633_p13, %p2632_p12 }
  0x21   :  { %p2635_p1 = pnand %p2634_p0, %p2628_p11 }
  0x23   :  { %2638 = shalt.err (!%p2635_p1)
}
  0x24   :  { %30 = dma.hbm_to_vmem [thread:$0]  %s3542_s0, 256, %s2814_s30, [#allocation3], %s2761_s17, %s2761_s17, %s2762_s18  }
  0x25   :  { %s2763_s9 = smov [#allocation7]   ;;  %s2764_s11 = smov [#allocation8]  }
  0x26   :  { %s48_s10 = sshll.u32 %s2763_s9, 4  ;;  %s60_s12 = sshll.u32 %s2764_s11, 4  ;;  %s49_s10 = int_to_ptr.vmem [resolvable:$true] %s48_s10  ;;  %s2851_s12 = int_to_ptr.vmem [resolvable:$true] %s60_s12 }
  0x27   :  { %s2639_s15 = scalar_lea.hbm %s3544_s2, 256 }
  0x28   :  { %p2640_p2 = scmp.ne.s32.totalorder %s3544_s2, %s2639_s15  ;;  %p2643_p3 = scmp.lt.u32.totalorder %s2639_s15, %s3544_s2 }
  0x2a   :  { %p2645_p4 = pnand %p2643_p3, %p2640_p2 }
  0x2c   :  { %2648 = shalt.err (!%p2645_p4)
}
  0x2d   :  { %s2649_s0 = scalar_lea.vmem %s49_s10, 256  ;;  %p2654_p6 = scmp.lt.s32.totalorder %s49_s10, %s49_s10 }
  0x2e   :  { %p2650_p5 = scmp.ne.s32.totalorder %s49_s10, %s2649_s0  ;;  %p2655_p7 = scmp.lt.s32.totalorder %s2649_s0, %s2649_s0 }
  0x30   :  { %p2656_p8 = por %p2655_p7, %p2654_p6 }
  0x32   :  { %p2657_p9 = pnand %p2656_p8, %p2650_p5 }
  0x34   :  { %2660 = shalt.err (!%p2657_p9)
}
  0x35   :  { %54 = dma.hbm_to_vmem [thread:$0]  %s3544_s2, 256, %s49_s10, [#allocation6], %s2761_s17, %s2761_s17, %s2762_s18  }
  0x36   :  { %s2661_s25 = scalar_lea.hbm %s3545_s3, 256 }
  0x37   :  { %p2662_p10 = scmp.ne.s32.totalorder %s3545_s3, %s2661_s25  ;;  %p2665_p11 = scmp.lt.u32.totalorder %s2661_s25, %s3545_s3 }
  0x39   :  { %p2667_p12 = pnand %p2665_p11, %p2662_p10 }
  0x3b   :  { %2670 = shalt.err (!%p2667_p12)
}
  0x3c   :  { %s2671_s28 = scalar_lea.vmem %s2851_s12, 256  ;;  %p2676_p0 = scmp.lt.s32.totalorder %s2851_s12, %s2851_s12 }
  0x3d   :  { %p2672_p13 = scmp.ne.s32.totalorder %s2851_s12, %s2671_s28  ;;  %p2677_p1 = scmp.lt.s32.totalorder %s2671_s28, %s2671_s28 }
  0x3f   :  { %p2678_p2 = por %p2677_p1, %p2676_p0 }
  0x41   :  { %p2679_p3 = pnand %p2678_p2, %p2672_p13 }
  0x43   :  { %2682 = shalt.err (!%p2679_p3)
}
  0x44   :  { %66 = dma.hbm_to_vmem [thread:$0]  %s3545_s3, 256, %s2851_s12, [#allocation9], %s2761_s17, %s2761_s17, %s2762_s18  }
  0x45   :  { %2749 = dma.done.wait [#allocation3], 256  }
  0x46   :  { %2750 = vsyncadd [#allocation3], 4294967040 }
  0x47   :  { %2751 = dma.done.wait [#allocation6], 512  }
  0x48   :  { %2752 = vsyncadd [#allocation6], 4294966784 }
  0x49   :  { %2753 = dma.done.wait [#allocation9], 256  }
  0x4a   :  { %2754 = vsyncadd [#allocation9], 4294967040  ;;  %v97_v0 = vlaneseq  ;;  %v2765_v1 = vmov 1966171168   ;;  %vm118_vm0 = vcmask 1041408   ;;  %vm299_vm10 = vcmask 1024  }
  0x4b   :  { %v95_v2 = vunpack.c.l.s4 %v2765_v1  ;;  %v2893_v6 = vld [vmem:[#allocation7] ss:$4 sm:$0x3]  ;;  %v2895_v7 = vld [vmem:[#allocation7 + $0x8] ss:$4 sm:$0x3] }
  0x4c   :  { %v2888_v3 = vshrl.u32 %v97_v0, 7  ;;  %v313_v8 = vcombine.low %v2893_v6, %v2895_v7  ;;  %v2899_v9 = vld [vmem:[#allocation2] ss:$4 sm:$0x3]  ;;  %s2766_s19 = smov [#allocation10]   ;;  %s2767_s23 = smov [#allocation11]  }
  0x4d   :  { %v96_v4 = vunpack.c.0.s8 %v95_v2  ;;  %v2901_v10 = vld [vmem:[#allocation2 + $0x8] ss:$4 sm:$0x3]  ;;  %v2905_v12 = vld [vmem:[#allocation8] ss:$4 sm:$0x3] }
  0x4e   :  { %v93_v11 = vcombine.low %v2899_v9, %v2901_v10  ;;  %v2907_v13 = vld [vmem:[#allocation8 + $0x8] ss:$4 sm:$0x3]  ;;  %v2912_v16 = vld [vmem:[#allocation5] ss:$4 sm:$0x3] }
  0x4f   :  { %v2891_v5 = vsub.s32 %v96_v4, %v2888_v3  ;;  %v346_v15 = vcombine.low %v2905_v12, %v2907_v13  ;;  %v2914_v17 = vld [vmem:[#allocation5 + $0x8] ss:$4 sm:$0x3]  ;;  %v2919_v20 = vld [vmem:[#allocation2 + $0x1] ss:$4 sm:$0x3] }
  0x50   :  { %v127_v19 = vcombine.low %v2912_v16, %v2914_v17  ;;  %v2921_v21 = vld [vmem:[#allocation2 + $0x9] ss:$4 sm:$0x3]  ;;  %v2927_v26 = vld [vmem:[#allocation5 + $0x1] ss:$4 sm:$0x3] }
  0x51   :  { %v320_v14 = vrot.slane %v313_v8, %v2891_v5  ;;  %v100_v18 = vrot.slane %v93_v11, %v2891_v5  ;;  %v353_v24 = vrot.slane %v346_v15, %v2891_v5  ;;  %v617_v25 = vcombine.low %v2919_v20, %v2921_v21  ;;  %v2929_v27 = vld [vmem:[#allocation5 + $0x9] ss:$4 sm:$0x3]  ;;  %v2940_v36 = vld [vmem:[#allocation7 + $0x1] ss:$4 sm:$0x3] }
  0x52   :  { %v134_v30 = vrot.slane %v127_v19, %v2891_v5  ;;  %v650_v31 = vcombine.low %v2927_v26, %v2929_v27  ;;  %v2942_v37 = vld [vmem:[#allocation7 + $0x9] ss:$4 sm:$0x3]  ;;  %v2952_v42 = vld [vmem:[#allocation8 + $0x1] ss:$4 sm:$0x3] }
  0x53   :  { %v321_v22 = vcombine.high %v320_v14, %v320_v14  ;;  %v328_v23 = vrot.slane %v320_v14, %v2891_v5  ;;  %v101_v28 = vcombine.high %v100_v18, %v100_v18  ;;  %v2932_v29 = vrot.slane %v100_v18, %v2891_v5  ;;  %v2954_v43 = vld [vmem:[#allocation8 + $0x9] ss:$4 sm:$0x3]  ;;  %v2960_v48 = vld [vmem:[#allocation2 + $0x2] ss:$4 sm:$0x3] }
  0x54   :  { %v354_v34 = vcombine.high %v353_v24, %v353_v24  ;;  %v361_v35 = vrot.slane %v353_v24, %v2891_v5  ;;  %v135_v40 = vcombine.high %v134_v30, %v134_v30  ;;  %v2950_v41 = vrot.slane %v134_v30, %v2891_v5  ;;  %v2967_v53 = vld [vmem:[#allocation2 + $0xa] ss:$4 sm:$0x3]  ;;  %v2973_v58 = vld [vmem:[#allocation5 + $0x2] ss:$4 sm:$0x3] }
  0x55   :  { %v335_v32 = vrot.slane %v321_v22, %v2891_v5  ;;  %v338_v33 = vsel %vm118_vm0, %v328_v23, 0.0  ;;  %v2945_v38 = vrot.slane %v101_v28, %v2891_v5  ;;  %v119_v39 = vsel %vm118_vm0, %v2932_v29, 0.0  ;;  %v2979_v63 = vld [vmem:[#allocation5 + $0xa] ss:$4 sm:$0x3]  ;;  %s2462_s20 = sshll.u32 %s2766_s19, 4  ;;  %s2463_s20 = int_to_ptr.vmem [resolvable:$true] %s2462_s20 }
  0x56   :  { %v368_v45 = vrot.slane %v354_v34, %v2891_v5  ;;  %v371_v46 = vsel %vm118_vm0, %v361_v35, 0.0  ;;  %v624_v47 = vrot.slane %v617_v25, %v2891_v5  ;;  %v149_v51 = vrot.slane %v135_v40, %v2891_v5  ;;  %v2986_v8 = vld [vmem:[#allocation7 + $0x2] ss:$4 sm:$0x3]  ;;  %s2472_s24 = sshll.u32 %s2767_s23, 4  ;;  %s2768_s26 = smov [#allocation13]   ;;  %s3497_s24 = int_to_ptr.vmem [resolvable:$true] %s2472_s24 }
  0x57   :  { %v339_v44 = vsel %vm118_vm0, %v335_v32, 0.0  ;;  %v120_v50 = vsel %vm118_vm0, %v2945_v38, 0.0  ;;  %v152_v52 = vsel %vm118_vm0, %v2950_v41, 0.0  ;;  %v657_v61 = vrot.slane %v650_v31, %v2891_v5  ;;  %v2992_v19 = vld [vmem:[#allocation7 + $0xa] ss:$4 sm:$0x3]  ;;  %p2688_p5 = scmp.lt.s32.totalorder %s2463_s20, %s2463_s20 }
  0x58   :  { %v340_v49 = vadd.f32 %v339_v44, %v338_v33  ;;  %v121_v54 = vadd.f32 %v120_v50, %v119_v39  ;;  %v372_v55 = vsel %vm118_vm0, %v368_v45, 0.0  ;;  %v625_v56 = vcombine.high %v624_v47, %v624_v47  ;;  %s2486_s27 = sshll.u32 %s2768_s26, 4  ;;  %s2683_s1 = scalar_lea.vmem %s2463_s20, 16  ;;  %s2487_s27 = int_to_ptr.vmem [resolvable:$true] %s2486_s27 }
  0x59   :  { %v2971_v57 = vrot.slane %v624_v47, %v2891_v5  ;;  %v373_v59 = vadd.f32 %v372_v55, %v371_v46  ;;  %v153_v60 = vsel %vm118_vm0, %v149_v51, 0.0  ;;  %v835_v62 = vcombine.low %v2940_v36, %v2942_v37  ;;  %v3009_v47 = vld [vmem:[#allocation8 + $0x2] ss:$4 sm:$0x3]  ;;  %p2684_p4 = scmp.ne.s32.totalorder %s2463_s20, %s2683_s1  ;;  %s2687_s28 = scalar_lea.vmem %s2463_s20, 32 }
  0x5a   :  { %341 = vadd.xlane.f32.xlu1 %v340_v49  ;;  %122 = vadd.xlane.f32.xlu0 %v121_v54  ;;  %v154_v0 = vadd.f32 %v153_v60, %v152_v52  ;;  %v639_v1 = vrot.slane %v625_v56, %v2891_v5  ;;  %v868_v4 = vcombine.low %v2952_v42, %v2954_v43  ;;  %v3011_v49 = vld [vmem:[#allocation8 + $0xa] ss:$4 sm:$0x3]  ;;  %v3016_v56 = vld [vmem:[#allocation2 + $0x3] ss:$4 sm:$0x3]  ;;  %p2689_p6 = scmp.lt.s32.totalorder %s2687_s28, %s2683_s1 }
  0x5b   :  { %v642_v2 = vsel %vm118_vm0, %v2971_v57, 0.0  ;;  %v658_v11 = vcombine.high %v657_v61, %v657_v61  ;;  %v665_v14 = vrot.slane %v657_v61, %v2891_v5  ;;  %v842_v15 = vrot.slane %v835_v62, %v2891_v5 }
  0x5c   :  { %v1279_v18 = vcombine.low %v2960_v48, %v2967_v53  ;;  %v643_v22 = vsel %vm118_vm0, %v639_v1, 0.0  ;;  %v875_v23 = vrot.slane %v868_v4, %v2891_v5  ;;  %v1312_v24 = vcombine.low %v2973_v58, %v2979_v63  ;;  %1185 = vmatprep.mubr.f32.mxu1 %v639_v1  ;;  %v3022_v1 = vld [vmem:[#allocation5 + $0x3] ss:$4 sm:$0x3]  ;;  %p2690_p7 = por %p2689_p6, %p2688_p5 }
  0x5d   :  { %v1497_v25 = vcombine.low %v2986_v8, %v2992_v19  ;;  %v644_v28 = vadd.f32 %v643_v22, %v642_v2  ;;  %v672_v30 = vrot.slane %v658_v11, %v2891_v5  ;;  %v675_v31 = vsel %vm118_vm0, %v665_v14, 0.0 }
  0x5e   :  { %374 = vadd.xlane.f32.xlu1 %v373_v59  ;;  %v843_v32 = vcombine.high %v842_v15, %v842_v15  ;;  %155 = vadd.xlane.f32.xlu0 %v154_v0  ;;  %v850_v33 = vrot.slane %v842_v15, %v2891_v5  ;;  %v876_v34 = vcombine.high %v875_v23, %v875_v23  ;;  %v3018_v59 = vld [vmem:[#allocation2 + $0xb] ss:$4 sm:$0x3]  ;;  %p2691_p8 = pnand %p2690_p7, %p2684_p4 }
  0x5f   :  { %v883_v35 = vrot.slane %v875_v23, %v2891_v5  ;;  %v1286_v39 = vrot.slane %v1279_v18, %v2891_v5  ;;  %v676_v40 = vsel %vm118_vm0, %v672_v30, 0.0  ;;  %v1319_v45 = vrot.slane %v1312_v24, %v2891_v5  ;;  %1121 = vmatprep.subr.mxu1 %v672_v30  ;;  %v3026_v18 = vld [vmem:[#allocation5 + $0xb] ss:$4 sm:$0x3] }
  0x60   :  { %v857_v44 = vrot.slane %v843_v32, %v2891_v5  ;;  %v1504_v46 = vrot.slane %v1497_v25, %v2891_v5  ;;  %v677_v50 = vadd.f32 %v676_v40, %v675_v31  ;;  %v860_v52 = vsel %vm118_vm0, %v850_v33, 0.0  ;;  %1122 = vmatpush1.xpose.msra.mxu1 %v665_v14  ;;  %v3031_v25 = vld [vmem:[#allocation7 + $0x3] ss:$4 sm:$0x3] }
  0x61   :  { %v890_v54 = vrot.slane %v876_v34, %v2891_v5  ;;  %v893_v55 = vsel %vm118_vm0, %v883_v35, 0.0  ;;  %v1287_v61 = vcombine.high %v1286_v39, %v1286_v39  ;;  %v1294_v62 = vrot.slane %v1286_v39, %v2891_v5  ;;  %1191 = vmatprep.subr.mxu1 %v149_v51  ;;  %v3033_v51 = vld [vmem:[#allocation7 + $0xb] ss:$4 sm:$0x3] }
  0x62   :  { %v861_v60 = vsel %vm118_vm0, %v857_v44, 0.0  ;;  %v1320_v0 = vcombine.high %v1319_v45, %v1319_v45  ;;  %645 = vadd.xlane.f32.xlu0 %v644_v28  ;;  %678 = vadd.xlane.f32.xlu1 %v677_v50  ;;  %v1327_v11 = vrot.slane %v1319_v45, %v2891_v5  ;;  %v1505_v15 = vcombine.high %v1504_v46, %v1504_v46  ;;  %v3041_v33 = vld [vmem:[#allocation8 + $0x3] ss:$4 sm:$0x3] }
  0x63   :  { %v862_v2 = vadd.f32 %v861_v60, %v860_v52  ;;  %v894_v4 = vsel %vm118_vm0, %v890_v54, 0.0  ;;  %v1301_v22 = vrot.slane %v1287_v61, %v2891_v5  ;;  %v1304_v23 = vsel %vm118_vm0, %v1294_v62, 0.0  ;;  %1186 = vmatmul.mubr.f32.vlgmr.msra.gmra.mrb[0].mxu1 %v2971_v57  ;;  %v3051_v40 = vld [vmem:[#allocation8 + $0xb] ss:$4 sm:$0x3] }
  0x64   :  { %v895_v14 = vadd.f32 %v894_v4, %v893_v55  ;;  %v1334_v24 = vrot.slane %v1320_v0, %v2891_v5  ;;  %v1337_v28 = vsel %vm118_vm0, %v1327_v11, 0.0  ;;  %v1512_v30 = vrot.slane %v1504_v46, %v2891_v5  ;;  %1192 = vmatpush1.xpose.msra.mxu1 %v2950_v41  ;;  %1255 = vmatprep.mubr.f32.mxu1 %v2945_v38 }
  0x65   :  { %v1519_v31 = vrot.slane %v1505_v15, %v2891_v5  ;;  %v1530_v32 = vcombine.low %v3009_v47, %v3011_v49  ;;  %v1305_v34 = vsel %vm118_vm0, %v1301_v22, 0.0  ;;  %v1872_v57 = vcombine.low %v3016_v56, %v3018_v59  ;;  %1847 = vmatprep.mubr.f32.mxu0 %v1301_v22 }
  0x66   :  { %v1338_v35 = vsel %vm118_vm0, %v1334_v24, 0.0  ;;  %v1905_v39 = vcombine.low %v3022_v1, %v3026_v18  ;;  %1783 = vmatprep.subr.mxu0 %v1334_v24  ;;  %863 = vadd.xlane.f32.xlu0 %v862_v2  ;;  %v1306_v44 = vadd.f32 %v1305_v34, %v1304_v23  ;;  %v1522_v38 = vsel %vm118_vm0, %v1512_v30, 0.0 }
  0x67   :  { %896 = vadd.xlane.f32.xlu1 %v895_v14  ;;  %v1339_v41 = vadd.f32 %v1338_v35, %v1337_v28  ;;  %v1523_v45 = vsel %vm118_vm0, %v1519_v31, 0.0  ;;  %v1537_v46 = vrot.slane %v1530_v32, %v2891_v5  ;;  %v1879_v50 = vrot.slane %v1872_v57, %v2891_v5  ;;  %1784 = vmatpush1.xpose.msra.mxu0 %v1327_v11 }
  0x68   :  { %v1912_v52 = vrot.slane %v1905_v39, %v2891_v5  ;;  %v1524_v54 = vadd.f32 %v1523_v45, %v1522_v38  ;;  %v2090_v55 = vcombine.low %v3031_v25, %v3033_v51  ;;  %v2123_v60 = vcombine.low %v3041_v33, %v3051_v40 }
  0x69   :  { %v1538_v61 = vcombine.high %v1537_v46, %v1537_v46  ;;  %v1545_v0 = vrot.slane %v1537_v46, %v2891_v5  ;;  %v1880_v2 = vcombine.high %v1879_v50, %v1879_v50  ;;  %v1887_v4 = vrot.slane %v1879_v50, %v2891_v5 }
  0x6a   :  { %1307 = vadd.xlane.f32.xlu0 %v1306_v44  ;;  %v1913_v15 = vcombine.high %v1912_v52, %v1912_v52  ;;  %v1920_v14 = vrot.slane %v1912_v52, %v2891_v5  ;;  %v2097_v11 = vrot.slane %v2090_v55, %v2891_v5  ;;  %1848 = vmatmul.mubr.f32.vlgmr.msra.gmra.mrb[0].mxu0 %v1294_v62 }
  0x6b   :  { %1340 = vadd.xlane.f32.xlu1 %v1339_v41  ;;  %v1552_v22 = vrot.slane %v1538_v61, %v2891_v5  ;;  %v1555_v23 = vsel %vm118_vm0, %v1545_v0, 0.0  ;;  %v1894_v24 = vrot.slane %v1880_v2, %v2891_v5  ;;  %v1897_v28 = vsel %vm118_vm0, %v1887_v4, 0.0  ;;  %1256 = vmatmul.mubr.f32.vlgmr.msra.gmra.mrb[0].mxu1 %v2932_v29 }
  0x6c   :  { %v1927_v30 = vrot.slane %v1913_v15, %v2891_v5  ;;  %v2098_v31 = vcombine.high %v2097_v11, %v2097_v11  ;;  %v2105_v32 = vrot.slane %v2097_v11, %v2891_v5  ;;  %v1930_v57 = vsel %vm118_vm0, %v1920_v14, 0.0 }
  0x6d   :  { %v1556_v34 = vsel %vm118_vm0, %v1552_v22, 0.0  ;;  %v1898_v35 = vsel %vm118_vm0, %v1894_v24, 0.0  ;;  %v2130_v39 = vrot.slane %v2123_v60, %v2891_v5  ;;  %2440 = vmatprep.mubr.f32.mxu0 %v1894_v24  ;;  %v3086_v2 = vsub.s32 0, %v2888_v3 }
  0x6e   :  { %1525 = vadd.xlane.f32.xlu0 %v1524_v54  ;;  %v1557_v44 = vadd.f32 %v1556_v34, %v1555_v23  ;;  %v1899_v41 = vadd.f32 %v1898_v35, %v1897_v28  ;;  %v1931_v62 = vsel %vm118_vm0, %v1927_v30, 0.0  ;;  %v2112_v29 = vrot.slane %v2098_v31, %v2891_v5  ;;  %2376 = vmatprep.subr.mxu0 %v1927_v30 }
  0x6f   :  { %v2115_v38 = vsel %vm118_vm0, %v2105_v32, 0.0  ;;  %v2131_v45 = vcombine.high %v2130_v39, %v2130_v39  ;;  %v2138_v46 = vrot.slane %v2130_v39, %v2891_v5  ;;  %2377 = vmatpush1.xpose.msra.mxu0 %v1920_v14  ;;  %v1932_v50 = vadd.f32 %v1931_v62, %v1930_v57 }
  0x70   :  { %1558 = vadd.xlane.f32.xlu1 %v1557_v44  ;;  %v2116_v52 = vsel %vm118_vm0, %v2112_v29, 0.0  ;;  %v3089_v15 = vsub.s32 1, %v2888_v3 }
  0x71   :  { %v2145_v55 = vrot.slane %v2131_v45, %v2891_v5  ;;  %v2148_v54 = vsel %vm118_vm0, %v2138_v46, 0.0  ;;  %v2117_v60 = vadd.f32 %v2116_v52, %v2115_v38 }
  0x72   :  { %1900 = vadd.xlane.f32.xlu0 %v1899_v41  ;;  %2441 = vmatmul.mubr.f32.vlgmr.msra.gmra.mrb[0].mxu0 %v1887_v4 }
  0x73   :  { %v2149_v61 = vsel %vm118_vm0, %v2145_v55, 0.0 }
  0x74   :  { %1933 = vadd.xlane.f32.xlu1 %v1932_v50  ;;  %v2150_v0 = vadd.f32 %v2149_v61, %v2148_v54 }
  0x76   :  { %2118 = vadd.xlane.f32.xlu0 %v2117_v60 }
  0x78   :  { %2151 = vadd.xlane.f32.xlu1 %v2150_v0 }
  0xe7   :  { %v342_v14 = vpop.xlane.xlu1 %341  ;;  %v123_v22 = vpop.xlane.xlu0 %122 }
  0xe8   :  { %v343_v11 = vmul.f32 0.00390625, %v342_v14  ;;  %v124_v23 = vmul.f32 0.00390625, %v123_v22 }
  0xea   :  { %v381_v24 = vrot.slane %v343_v11, %v3086_v2  ;;  %v385_v28 = vrot.slane %v343_v11, %v3089_v15  ;;  %v162_v4 = vrot.slane %v124_v23, %v3086_v2  ;;  %v166_v30 = vrot.slane %v124_v23, %v3089_v15 }
  0xeb   :  { %v375_v31 = vpop.xlane.xlu1 %374  ;;  %v156_v3 = vpop.xlane.xlu0 %155 }
  0xec   :  { %v388_v32 = vsub.f32 %v2893_v6, %v381_v24  ;;  %v389_v34 = vsub.f32 %v2895_v7, %v385_v28  ;;  %v376_v35 = vmul.f32 0.00390625, %v375_v31  ;;  %v169_v57 = vsub.f32 %v2899_v9, %v162_v4 }
  0xed   :  { %v170_v39 = vsub.f32 %v2901_v10, %v166_v30  ;;  %v157_v44 = vmul.f32 0.00390625, %v156_v3 }
  0xee   :  { %v437_v41 = vmul.f32 %v388_v32, %v388_v32  ;;  %v438_v62 = vmul.f32 %v389_v34, %v389_v34  ;;  %v394_v29 = vrot.slane %v376_v35, %v3086_v2  ;;  %v398_v38 = vrot.slane %v376_v35, %v3089_v15 }
  0xef   :  { %v175_v45 = vrot.slane %v157_v44, %v3086_v2  ;;  %v179_v46 = vrot.slane %v157_v44, %v3089_v15  ;;  %v218_v6 = vmul.f32 %v169_v57, %v169_v57  ;;  %v219_v50 = vmul.f32 %v170_v39, %v170_v39  ;;  %v646_v9 = vpop.xlane.xlu0 %645  ;;  %v679_v55 = vpop.xlane.xlu1 %678 }
  0xf0   :  { %v401_v7 = vsub.f32 %v2905_v12, %v394_v29  ;;  %v402_v52 = vsub.f32 %v2907_v13, %v398_v38  ;;  %v647_v60 = vmul.f32 0.00390625, %v646_v9  ;;  %v680_v61 = vmul.f32 0.00390625, %v679_v55 }
  0xf1   :  { %v182_v10 = vsub.f32 %v2912_v16, %v175_v45  ;;  %v183_v54 = vsub.f32 %v2914_v17, %v179_v46  ;;  %v441_v11 = vcombine.low %v437_v41, %v438_v62  ;;  %v222_v35 = vcombine.low %v218_v6, %v219_v50 }
  0xf2   :  { %v3107_v0 = vmul.f32 %v401_v7, %v388_v32  ;;  %v3109_v14 = vmul.f32 %v402_v52, %v389_v34  ;;  %v3111_v22 = vmul.f32 %v401_v7, %v401_v7  ;;  %v3113_v23 = vmul.f32 %v402_v52, %v402_v52 }
  0xf3   :  { %v3115_v12 = vmul.f32 %v182_v10, %v169_v57  ;;  %v3117_v13 = vmul.f32 %v183_v54, %v170_v39  ;;  %v685_v24 = vrot.slane %v647_v60, %v3086_v2  ;;  %v689_v16 = vrot.slane %v647_v60, %v3089_v15  ;;  %v864_v4 = vpop.xlane.xlu0 %863 }
  0xf4   :  { %v698_v17 = vrot.slane %v680_v61, %v3086_v2  ;;  %v702_v28 = vrot.slane %v680_v61, %v3089_v15  ;;  %v897_v30 = vpop.xlane.xlu1 %896  ;;  %v3123_v31 = vmul.f32 %v182_v10, %v182_v10  ;;  %v865_v32 = vmul.f32 0.00390625, %v864_v4 }
  0xf5   :  { %v898_v34 = vmul.f32 0.00390625, %v897_v30  ;;  %v692_v3 = vsub.f32 %v2919_v20, %v685_v24  ;;  %v693_v57 = vsub.f32 %v2921_v21, %v689_v16  ;;  %v3133_v45 = vmul.f32 %v183_v54, %v183_v54 }
  0xf6   :  { %v705_v39 = vsub.f32 %v2927_v26, %v698_v17  ;;  %v706_v44 = vsub.f32 %v2929_v27, %v702_v28  ;;  %v903_v41 = vrot.slane %v865_v32, %v3086_v2  ;;  %v907_v62 = vrot.slane %v865_v32, %v3089_v15 }
  0xf7   :  { %v916_v29 = vrot.slane %v898_v34, %v3086_v2  ;;  %v920_v38 = vrot.slane %v898_v34, %v3089_v15  ;;  %v3135_v46 = vmul.f32 %v692_v3, %v692_v3  ;;  %v3137_v6 = vmul.f32 %v693_v57, %v693_v57  ;;  %v1308_v20 = vpop.xlane.xlu0 %1307 }
  0xf8   :  { %v1341_v21 = vpop.xlane.xlu1 %1340  ;;  %v448_v26 = vrot.slane %v441_v11, %v2891_v5  ;;  %v3140_v50 = vmul.f32 %v705_v39, %v692_v3  ;;  %v3142_v27 = vmul.f32 %v706_v44, %v693_v57  ;;  %v910_v7 = vsub.f32 %v2940_v36, %v903_v41 }
  0xf9   :  { %v911_v52 = vsub.f32 %v2942_v37, %v907_v62  ;;  %v923_v9 = vsub.f32 %v2952_v42, %v916_v29  ;;  %v924_v55 = vsub.f32 %v2954_v43, %v920_v38  ;;  %v1309_v10 = vmul.f32 0.00390625, %v1308_v20 }
  0xfa   :  { %v1342_v54 = vmul.f32 0.00390625, %v1341_v21  ;;  %v3148_v60 = vmul.f32 %v705_v39, %v705_v39  ;;  %v3150_v61 = vmul.f32 %v706_v44, %v706_v44  ;;  %v3152_v24 = vmul.f32 %v910_v7, %v910_v7 }
  0xfb   :  { %v229_v11 = vrot.slane %v222_v35, %v2891_v5  ;;  %v3155_v16 = vmul.f32 %v911_v52, %v911_v52  ;;  %v3157_v17 = vmul.f32 %v923_v9, %v910_v7  ;;  %v3159_v36 = vmul.f32 %v924_v55, %v911_v52  ;;  %v1526_v37 = vpop.xlane.xlu0 %1525 }
  0xfc   :  { %v449_v42 = vcombine.high %v448_v26, %v448_v26  ;;  %v1347_v43 = vrot.slane %v1309_v10, %v3086_v2  ;;  %v1351_v28 = vrot.slane %v1309_v10, %v3089_v15  ;;  %v1360_v4 = vrot.slane %v1342_v54, %v3086_v2 }
  0xfd   :  { %v1364_v30 = vrot.slane %v1342_v54, %v3089_v15  ;;  %v3165_v32 = vmul.f32 %v923_v9, %v923_v9  ;;  %v230_v34 = vcombine.high %v229_v11, %v229_v11  ;;  %v237_v35 = vrot.slane %v229_v11, %v2891_v5  ;;  %v1559_v57 = vpop.xlane.xlu1 %1558 }
  0xfe   :  { %v1527_v3 = vmul.f32 0.00390625, %v1526_v37  ;;  %v1354_v39 = vsub.f32 %v2960_v48, %v1347_v43  ;;  %v1355_v44 = vsub.f32 %v2967_v53, %v1351_v28  ;;  %v1367_v41 = vsub.f32 %v2973_v58, %v1360_v4 }
  0xff   :  { %v1368_v62 = vsub.f32 %v2979_v63, %v1364_v30  ;;  %v244_v29 = vrot.slane %v230_v34, %v2891_v5  ;;  %v456_v21 = vrot.slane %v448_v26, %v2891_v5  ;;  %v3176_v7 = vmul.f32 %v924_v55, %v924_v55  ;;  %v1901_v53 = vpop.xlane.xlu0 %1900 }
 0x100   :  { %v1565_v38 = vrot.slane %v1527_v3, %v3086_v2  ;;  %v1569_v20 = vrot.slane %v1527_v3, %v3089_v15  ;;  %v3178_v52 = vmul.f32 %v1354_v39, %v1354_v39  ;;  %v3180_v9 = vmul.f32 %v1355_v44, %v1355_v44 }
 0x101   :  { %v247_v48 = vsel %vm118_vm0, %v237_v35, 0.0  ;;  %v3183_v58 = vmul.f32 %v1367_v41, %v1354_v39  ;;  %v3185_v63 = vmul.f32 %v1368_v62, %v1355_v44  ;;  %v3187_v10 = vmul.f32 %v1367_v41, %v1367_v41  ;;  %v1934_v43 = vpop.xlane.xlu1 %1933 }
 0x102   :  { %v248_v54 = vsel %vm118_vm0, %v244_v29, 0.0  ;;  %v1572_v26 = vsub.f32 %v2986_v8, %v1565_v38  ;;  %v1560_v55 = vmul.f32 0.00390625, %v1559_v57  ;;  %v463_v37 = vrot.slane %v449_v42, %v2891_v5 }
 0x103   :  { %v249_v11 = vadd.f32 %v248_v54, %v247_v48  ;;  %v1573_v28 = vsub.f32 %v2992_v19, %v1569_v20  ;;  %v466_v4 = vsel %vm118_vm0, %v456_v21, 0.0  ;;  %v256_v30 = vcombine.low %v3123_v31, %v3133_v45  ;;  %v2119_v54 = vpop.xlane.xlu0 %2118 }
 0x104   :  { %v1902_v34 = vmul.f32 0.00390625, %v1901_v53  ;;  %v3196_v35 = vmul.f32 %v1368_v62, %v1368_v62  ;;  %v1578_v3 = vrot.slane %v1560_v55, %v3086_v2  ;;  %v1582_v39 = vrot.slane %v1560_v55, %v3089_v15 }
 0x105   :  { %250 = vadd.xlane.f32.xlu0 %v249_v11  ;;  %v467_v8 = vsel %vm118_vm0, %v463_v37, 0.0  ;;  %v263_v42 = vrot.slane %v256_v30, %v2891_v5  ;;  %v1935_v45 = vmul.f32 0.00390625, %v1934_v43  ;;  %v475_v62 = vcombine.low %v3111_v22, %v3113_v23  ;;  %v2152_v11 = vpop.xlane.xlu1 %2151 }
 0x106   :  { %v468_v57 = vadd.f32 %v467_v8, %v466_v4  ;;  %v1940_v19 = vrot.slane %v1902_v34, %v3086_v2  ;;  %v1944_v44 = vrot.slane %v1902_v34, %v3089_v15  ;;  %v1585_v41 = vsub.f32 %v3009_v47, %v1578_v3 }
 0x107   :  { %v1586_v31 = vsub.f32 %v3011_v49, %v1582_v39  ;;  %v3208_v29 = vmul.f32 %v1572_v26, %v1572_v26  ;;  %v3210_v38 = vmul.f32 %v1573_v28, %v1573_v28  ;;  %v264_v20 = vcombine.high %v263_v42, %v263_v42 }
 0x108   :  { %v271_v21 = vrot.slane %v263_v42, %v2891_v5  ;;  %v3213_v48 = vmul.f32 %v1585_v41, %v1572_v26  ;;  %v1947_v47 = vsub.f32 %v3016_v56, %v1940_v19  ;;  %v1948_v49 = vsub.f32 %v3018_v59, %v1944_v44 }
 0x109   :  { %v3215_v53 = vmul.f32 %v1586_v31, %v1573_v28  ;;  %469 = vadd.xlane.f32.xlu0 %v468_v57  ;;  %v3219_v55 = vmul.f32 %v1585_v41, %v1585_v41  ;;  %v3221_v22 = vmul.f32 %v1586_v31, %v1586_v31  ;;  %v278_v23 = vrot.slane %v264_v20, %v2891_v5 }
 0x10a   :  { %v281_v37 = vsel %vm118_vm0, %v271_v21, 0.0  ;;  %v1953_v26 = vrot.slane %v1935_v45, %v3086_v2  ;;  %v1957_v43 = vrot.slane %v1935_v45, %v3089_v15  ;;  %v482_v28 = vrot.slane %v475_v62, %v2891_v5 }
 0x10b   :  { %v745_v56 = vcombine.low %v3135_v46, %v3137_v6  ;;  %v282_v59 = vsel %vm118_vm0, %v278_v23, 0.0  ;;  %v2120_v4 = vmul.f32 0.00390625, %v2119_v54  ;;  %v2153_v30 = vmul.f32 0.00390625, %v2152_v11 }
 0x10c   :  { %v779_v34 = vcombine.low %v3148_v60, %v3150_v61  ;;  %v283_v3 = vadd.f32 %v282_v59, %v281_v37  ;;  %v1960_v39 = vsub.f32 %v3022_v1, %v1953_v26  ;;  %v1961_v8 = vsub.f32 %v3026_v18, %v1957_v43 }
 0x10d   :  { %v483_v57 = vcombine.high %v482_v28, %v482_v28  ;;  %v490_v42 = vrot.slane %v482_v28, %v2891_v5  ;;  %v752_v19 = vrot.slane %v745_v56, %v2891_v5  ;;  %v2158_v44 = vrot.slane %v2120_v4, %v3086_v2 }
 0x10e   :  { %v2162_v46 = vrot.slane %v2120_v4, %v3089_v15  ;;  %284 = vadd.xlane.f32.xlu1 %v283_v3  ;;  %v3239_v6 = vmul.f32 %v1947_v47, %v1947_v47  ;;  %v3241_v41 = vmul.f32 %v1948_v49, %v1948_v49  ;;  %v3243_v60 = vmul.f32 %v1960_v39, %v1947_v47 }
 0x10f   :  { %v3245_v61 = vmul.f32 %v1961_v8, %v1948_v49  ;;  %v497_v1 = vrot.slane %v483_v57, %v2891_v5  ;;  %v500_v18 = vsel %vm118_vm0, %v490_v42, 0.0  ;;  %v753_v31 = vcombine.high %v752_v19, %v752_v19 }
 0x110   :  { %v760_v45 = vrot.slane %v752_v19, %v2891_v5  ;;  %v3251_v62 = vsub.f32 %v3031_v25, %v2158_v44  ;;  %v3254_v20 = vsub.f32 %v3033_v51, %v2162_v46  ;;  %v2171_v21 = vrot.slane %v2153_v30, %v3086_v2 }
 0x111   :  { %v2175_v47 = vrot.slane %v2153_v30, %v3089_v15  ;;  %v501_v49 = vsel %vm118_vm0, %v497_v1, 0.0  ;;  %v767_v54 = vrot.slane %v753_v31, %v2891_v5  ;;  %v786_v23 = vrot.slane %v779_v34, %v2891_v5 }
 0x112   :  { %v770_v11 = vsel %vm118_vm0, %v760_v45, 0.0  ;;  %v3262_v37 = vmul.f32 %v1960_v39, %v1960_v39  ;;  %v3264_v26 = vmul.f32 %v1961_v8, %v1961_v8  ;;  %v502_v25 = vadd.f32 %v501_v49, %v500_v18 }
 0x113   :  { %v3267_v51 = vsub.f32 %v3041_v33, %v2171_v21  ;;  %v771_v2 = vsel %vm118_vm0, %v767_v54, 0.0  ;;  %v3271_v15 = vsub.f32 %v3051_v40, %v2175_v47  ;;  %v787_v43 = vcombine.high %v786_v23, %v786_v23 }
 0x114   :  { %v794_v28 = vrot.slane %v786_v23, %v2891_v5  ;;  %503 = vadd.xlane.f32.xlu1 %v502_v25  ;;  %v772_v56 = vadd.f32 %v771_v2, %v770_v11  ;;  %v3276_v59 = vmul.f32 %v3251_v62, %v3251_v62  ;;  %v3280_v4 = vmul.f32 %v3254_v20, %v3254_v20 }
 0x115   :  { %v963_v33 = vcombine.low %v3152_v24, %v3155_v16  ;;  %v3286_v40 = vmul.f32 %v3267_v51, %v3267_v51  ;;  %v3290_v30 = vmul.f32 %v3271_v15, %v3271_v15  ;;  %v801_v34 = vrot.slane %v787_v43, %v2891_v5 }
 0x116   :  { %v804_v3 = vsel %vm118_vm0, %v794_v28, 0.0  ;;  %773 = vadd.xlane.f32.xlu0 %v772_v56  ;;  %v997_v8 = vcombine.low %v3165_v32, %v3176_v7  ;;  %v1407_v24 = vcombine.low %v3178_v52, %v3180_v9  ;;  %v1441_v16 = vcombine.low %v3187_v10, %v3196_v35 }
 0x117   :  { %v970_v39 = vrot.slane %v963_v33, %v2891_v5  ;;  %v805_v57 = vsel %vm118_vm0, %v801_v34, 0.0  ;;  %v1625_v42 = vcombine.low %v3208_v29, %v3210_v38  ;;  %v1659_v19 = vcombine.low %v3219_v55, %v3221_v22 }
 0x118   :  { %v2000_v44 = vcombine.low %v3239_v6, %v3241_v41  ;;  %v806_v46 = vadd.f32 %v805_v57, %v804_v3  ;;  %v1004_v7 = vrot.slane %v997_v8, %v2891_v5  ;;  %v1414_v52 = vrot.slane %v1407_v24, %v2891_v5 }
 0x119   :  { %v971_v1 = vcombine.high %v970_v39, %v970_v39  ;;  %v978_v32 = vrot.slane %v970_v39, %v2891_v5  ;;  %v1448_v9 = vrot.slane %v1441_v16, %v2891_v5  ;;  %v1632_v10 = vrot.slane %v1625_v42, %v2891_v5 }
 0x11a   :  { %v1666_v35 = vrot.slane %v1659_v19, %v2891_v5  ;;  %807 = vadd.xlane.f32.xlu1 %v806_v46  ;;  %v1005_v55 = vcombine.high %v1004_v7, %v1004_v7  ;;  %v1012_v22 = vrot.slane %v1004_v7, %v2891_v5  ;;  %v1415_v6 = vcombine.high %v1414_v52, %v1414_v52 }
 0x11b   :  { %v985_v29 = vrot.slane %v971_v1, %v2891_v5  ;;  %v988_v38 = vsel %vm118_vm0, %v978_v32, 0.0  ;;  %v1422_v41 = vrot.slane %v1414_v52, %v2891_v5  ;;  %v1449_v18 = vcombine.high %v1448_v9, %v1448_v9 }
 0x11c   :  { %v1456_v31 = vrot.slane %v1448_v9, %v2891_v5  ;;  %v1019_v21 = vrot.slane %v1005_v55, %v2891_v5  ;;  %v1022_v47 = vsel %vm118_vm0, %v1012_v22, 0.0  ;;  %v1633_v49 = vcombine.high %v1632_v10, %v1632_v10 }
 0x11d   :  { %v989_v45 = vsel %vm118_vm0, %v985_v29, 0.0  ;;  %v1429_v11 = vrot.slane %v1415_v6, %v2891_v5  ;;  %v1432_v23 = vsel %vm118_vm0, %v1422_v41, 0.0  ;;  %v1463_v25 = vrot.slane %v1449_v18, %v2891_v5 }
 0x11e   :  { %v990_v54 = vadd.f32 %v989_v45, %v988_v38  ;;  %v1023_v2 = vsel %vm118_vm0, %v1019_v21, 0.0  ;;  %v1466_v43 = vsel %vm118_vm0, %v1456_v31, 0.0  ;;  %v1640_v28 = vrot.slane %v1632_v10, %v2891_v5 }
 0x11f   :  { %v1647_v56 = vrot.slane %v1633_v49, %v2891_v5  ;;  %v1024_v33 = vadd.f32 %v1023_v2, %v1022_v47  ;;  %v1433_v34 = vsel %vm118_vm0, %v1429_v11, 0.0  ;;  %v1467_v3 = vsel %vm118_vm0, %v1463_v25, 0.0 }
 0x120   :  { %991 = vadd.xlane.f32.xlu0 %v990_v54  ;;  %v1667_v39 = vcombine.high %v1666_v35, %v1666_v35  ;;  %v1434_v8 = vadd.f32 %v1433_v34, %v1432_v23  ;;  %v1468_v24 = vadd.f32 %v1467_v3, %v1466_v43  ;;  %v1650_v16 = vsel %vm118_vm0, %v1640_v28, 0.0 }
 0x121   :  { %v1651_v57 = vsel %vm118_vm0, %v1647_v56, 0.0  ;;  %1025 = vadd.xlane.f32.xlu1 %v1024_v33  ;;  %v1674_v19 = vrot.slane %v1666_v35, %v2891_v5  ;;  %v2007_v1 = vrot.slane %v2000_v44, %v2891_v5  ;;  %v2034_v32 = vcombine.low %v3262_v37, %v3264_v26 }
 0x122   :  { %v1652_v42 = vadd.f32 %v1651_v57, %v1650_v16  ;;  %v1681_v46 = vrot.slane %v1667_v39, %v2891_v5  ;;  %v2218_v7 = vcombine.low %v3276_v59, %v3280_v4  ;;  %v2252_v52 = vcombine.low %v3286_v40, %v3290_v30 }
 0x123   :  { %v188_v9 = vcombine.low %v3115_v12, %v3117_v13  ;;  %v1684_v10 = vsel %vm118_vm0, %v1674_v19, 0.0  ;;  %v2008_v29 = vcombine.high %v2007_v1, %v2007_v1  ;;  %v2015_v44 = vrot.slane %v2007_v1, %v2891_v5 }
 0x124   :  { %1435 = vadd.xlane.f32.xlu0 %v1434_v8  ;;  %v1685_v35 = vsel %vm118_vm0, %v1681_v46, 0.0  ;;  %v2041_v37 = vrot.slane %v2034_v32, %v2891_v5  ;;  %v2225_v26 = vrot.slane %v2218_v7, %v2891_v5  ;;  %v2259_v59 = vrot.slane %v2252_v52, %v2891_v5 }
 0x125   :  { %v1686_v38 = vadd.f32 %v1685_v35, %v1684_v10  ;;  %1469 = vadd.xlane.f32.xlu1 %v1468_v24  ;;  %v2022_v4 = vrot.slane %v2008_v29, %v2891_v5  ;;  %v2025_v12 = vsel %vm118_vm0, %v2015_v44, 0.0  ;;  %v195_v13 = vrot.slane %v188_v9, %v2891_v5 }
 0x126   :  { %v407_v40 = vcombine.low %v3107_v0, %v3109_v14  ;;  %v2042_v30 = vcombine.high %v2041_v37, %v2041_v37  ;;  %v2049_v55 = vrot.slane %v2041_v37, %v2891_v5  ;;  %v2226_v22 = vcombine.high %v2225_v26, %v2225_v26 }
 0x127   :  { %v2233_v6 = vrot.slane %v2225_v26, %v2891_v5  ;;  %v2026_v41 = vsel %vm118_vm0, %v2022_v4, 0.0  ;;  %v2260_v18 = vcombine.high %v2259_v59, %v2259_v59  ;;  %v2267_v31 = vrot.slane %v2259_v59, %v2891_v5 }
 0x128   :  { %1653 = vadd.xlane.f32.xlu0 %v1652_v42  ;;  %v196_v45 = vcombine.high %v195_v13, %v195_v13  ;;  %v2027_v21 = vadd.f32 %v2026_v41, %v2025_v12  ;;  %v2056_v47 = vrot.slane %v2042_v30, %v2891_v5  ;;  %v2059_v49 = vsel %vm118_vm0, %v2049_v55, 0.0 }
 0x129   :  { %v2240_v0 = vrot.slane %v2226_v22, %v2891_v5  ;;  %v3364_v14 = vmul.f32 %v3267_v51, %v3251_v62  ;;  %1687 = vadd.xlane.f32.xlu1 %v1686_v38  ;;  %v2243_v54 = vsel %vm118_vm0, %v2233_v6, 0.0  ;;  %v2274_v11 = vrot.slane %v2260_v18, %v2891_v5 }
 0x12a   :  { %v203_v23 = vrot.slane %v195_v13, %v2891_v5  ;;  %v2060_v25 = vsel %vm118_vm0, %v2056_v47, 0.0  ;;  %v210_v43 = vrot.slane %v196_v45, %v2891_v5  ;;  %v414_v28 = vrot.slane %v407_v40, %v2891_v5 }
 0x12b   :  { %v2244_v2 = vsel %vm118_vm0, %v2240_v0, 0.0  ;;  %v2061_v56 = vadd.f32 %v2060_v25, %v2059_v49  ;;  %v2277_v62 = vsel %vm118_vm0, %v2267_v31, 0.0  ;;  %v2278_v51 = vsel %vm118_vm0, %v2274_v11, 0.0 }
 0x12c   :  { %2028 = vadd.xlane.f32.xlu0 %v2027_v21  ;;  %v2245_v33 = vadd.f32 %v2244_v2, %v2243_v54  ;;  %v2181_v34 = vmul.f32 %v3271_v15, %v3254_v20  ;;  %v214_v3 = vsel %vm118_vm0, %v210_v43, 0.0  ;;  %v415_v39 = vcombine.high %v414_v28, %v414_v28 }
 0x12d   :  { %v422_v8 = vrot.slane %v414_v28, %v2891_v5  ;;  %2062 = vadd.xlane.f32.xlu1 %v2061_v56  ;;  %v213_v24 = vsel %vm118_vm0, %v203_v23, 0.0  ;;  %v711_v16 = vcombine.low %v3140_v50, %v3142_v27  ;;  %v929_v57 = vcombine.low %v3157_v17, %v3159_v36 }
 0x12e   :  { %v1373_v42 = vcombine.low %v3183_v58, %v3185_v63  ;;  %v2279_v19 = vadd.f32 %v2278_v51, %v2277_v62  ;;  %v429_v20 = vrot.slane %v415_v39, %v2891_v5  ;;  %v1591_v15 = vcombine.low %v3213_v48, %v3215_v53 }
 0x12f   :  { %v1966_v46 = vcombine.low %v3243_v60, %v3245_v61  ;;  %v215_v1 = vadd.f32 %v214_v3, %v213_v24  ;;  %v718_v32 = vrot.slane %v711_v16, %v2891_v5  ;;  %v936_v50 = vrot.slane %v929_v57, %v2891_v5 }
 0x130   :  { %2246 = vadd.xlane.f32.xlu0 %v2245_v33  ;;  %v1380_v27 = vrot.slane %v1373_v42, %v2891_v5  ;;  %v432_v17 = vsel %vm118_vm0, %v422_v8, 0.0  ;;  %v433_v36 = vsel %vm118_vm0, %v429_v20, 0.0  ;;  %v1598_v58 = vrot.slane %v1591_v15, %v2891_v5 }
 0x131   :  { %v2184_v63 = vcombine.low %v3364_v14, %v2181_v34  ;;  %2280 = vadd.xlane.f32.xlu1 %v2279_v19  ;;  %v719_v48 = vcombine.high %v718_v32, %v718_v32  ;;  %v726_v53 = vrot.slane %v718_v32, %v2891_v5  ;;  %v937_v60 = vcombine.high %v936_v50, %v936_v50 }
 0x132   :  { %v1973_v61 = vrot.slane %v1966_v46, %v2891_v5  ;;  %v944_v7 = vrot.slane %v936_v50, %v2891_v5  ;;  %v1381_v52 = vcombine.high %v1380_v27, %v1380_v27  ;;  %v1388_v9 = vrot.slane %v1380_v27, %v2891_v5 }
 0x133   :  { %v1599_v10 = vcombine.high %v1598_v58, %v1598_v58  ;;  %v434_v35 = vadd.f32 %v433_v36, %v432_v17  ;;  %v733_v29 = vrot.slane %v719_v48, %v2891_v5  ;;  %v736_v44 = vsel %vm118_vm0, %v726_v53, 0.0 }
 0x134   :  { %216 = vadd.xlane.f32.xlu0 %v215_v1  ;;  %v951_v38 = vrot.slane %v937_v60, %v2891_v5  ;;  %v954_v37 = vsel %vm118_vm0, %v944_v7, 0.0  ;;  %v1395_v26 = vrot.slane %v1381_v52, %v2891_v5  ;;  %v1606_v59 = vrot.slane %v1598_v58, %v2891_v5 }
 0x135   :  { %v1613_v4 = vrot.slane %v1599_v10, %v2891_v5  ;;  %435 = vadd.xlane.f32.xlu1 %v434_v35  ;;  %v737_v12 = vsel %vm118_vm0, %v733_v29, 0.0  ;;  %v1974_v40 = vcombine.high %v1973_v61, %v1973_v61  ;;  %v1398_v55 = vsel %vm118_vm0, %v1388_v9, 0.0 }
 0x136   :  { %v955_v13 = vsel %vm118_vm0, %v951_v38, 0.0  ;;  %v738_v30 = vadd.f32 %v737_v12, %v736_v44  ;;  %v1399_v6 = vsel %vm118_vm0, %v1395_v26, 0.0  ;;  %v1981_v41 = vrot.slane %v1973_v61, %v2891_v5 }
 0x137   :  { %v956_v22 = vadd.f32 %v955_v13, %v954_v37  ;;  %v1988_v18 = vrot.slane %v1974_v40, %v2891_v5  ;;  %v1616_v31 = vsel %vm118_vm0, %v1606_v59, 0.0  ;;  %v1617_v45 = vsel %vm118_vm0, %v1613_v4, 0.0 }
 0x138   :  { %739 = vadd.xlane.f32.xlu0 %v738_v30  ;;  %v2191_v21 = vrot.slane %v2184_v63, %v2891_v5  ;;  %v1400_v47 = vadd.f32 %v1399_v6, %v1398_v55  ;;  %v1618_v14 = vadd.f32 %v1617_v45, %v1616_v31  ;;  %v1991_v54 = vsel %vm118_vm0, %v1981_v41, 0.0 }
 0x139   :  { %957 = vadd.xlane.f32.xlu1 %v956_v22  ;;  %v1992_v11 = vsel %vm118_vm0, %v1988_v18, 0.0 }
 0x13a   :  { %v2192_v49 = vcombine.high %v2191_v21, %v2191_v21  ;;  %v2199_v0 = vrot.slane %v2191_v21, %v2891_v5  ;;  %v1993_v2 = vadd.f32 %v1992_v11, %v1991_v54 }
 0x13c   :  { %1401 = vadd.xlane.f32.xlu0 %v1400_v47  ;;  %v2206_v23 = vrot.slane %v2192_v49, %v2891_v5  ;;  %v2209_v25 = vsel %vm118_vm0, %v2199_v0, 0.0 }
 0x13d   :  { %1619 = vadd.xlane.f32.xlu1 %v1618_v14 }
 0x13e   :  { %v2210_v43 = vsel %vm118_vm0, %v2206_v23, 0.0 }
 0x13f   :  { %v2211_v28 = vadd.f32 %v2210_v43, %v2209_v25 }
 0x140   :  { %1994 = vadd.xlane.f32.xlu0 %v1993_v2 }
 0x141   :  { %2212 = vadd.xlane.f32.xlu1 %v2211_v28 }
 0x192   :  { %v251_v56 = vpop.xlane.xlu0 %250 }
 0x196   :  { %v470_v51 = vpop.xlane.xlu0 %469 }
 0x19b   :  { %v285_v33 = vpop.xlane.xlu1 %284 }
 0x19c   :  { %v286_v62 = vmul.f32 %v285_v33, %v251_v56  ;;  %v2579_v56 = vld [vmem:[#allocation2] ss:$4 sm:$0x3] }
 0x19d   :  { %v529_v33 = vmul.f32 %v2579_v56, %v2579_v56 }
 0x19e   :  { %2547 = vrsqrt.f32 %v286_v62  ;;  %vm289_vm1 = vcmp.eq.f32.partialorder %v286_v62, inf  ;;  %v292_v19 = vand.u32 2147483648, %v286_v62  ;;  %vm291_vm2 = vcmp.eq.f32.partialorder %v286_v62, 0.0 }
 0x1a1   :  { %v504_v34 = vpop.xlane.xlu1 %503 }
 0x1a2   :  { %v505_v3 = vmul.f32 %v504_v34, %v470_v51 }
 0x1a3   :  { %v774_v39 = vpop.xlane.xlu0 %773 }
 0x1a4   :  { %2549 = vrsqrt.f32 %v505_v3  ;;  %vm508_vm3 = vcmp.eq.f32.partialorder %v505_v3, inf  ;;  %v511_v36 = vand.u32 2147483648, %v505_v3  ;;  %vm510_vm4 = vcmp.eq.f32.partialorder %v505_v3, 0.0 }
 0x1a7   :  { %v808_v8 = vpop.xlane.xlu1 %807 }
 0x1a8   :  { %v2548_v24 = vpop.eup %2547  ;;  %v809_v16 = vmul.f32 %v808_v8, %v774_v39 }
 0x1a9   :  { %v288_v57 = vmul.f32 %v2548_v24, %v286_v62 }
 0x1aa   :  { %2551 = vrsqrt.f32 %v809_v16  ;;  %vm812_vm5 = vcmp.eq.f32.partialorder %v809_v16, inf  ;;  %v815_v10 = vand.u32 2147483648, %v809_v16  ;;  %vm814_vm6 = vcmp.eq.f32.partialorder %v809_v16, 0.0 }
 0x1ab   :  { %v290_v42 = vsel %vm289_vm1, %v286_v62, %v288_v57  ;;  %v2580_v62 = vld [vmem:[#allocation2 + $0x8] ss:$4 sm:$0x3] }
 0x1ac   :  { %v293_v15 = vsel %vm291_vm2, %v292_v19, %v290_v42  ;;  %v530_v51 = vmul.f32 %v2580_v62, %v2580_v62 }
 0x1ad   :  { %v992_v20 = vpop.xlane.xlu0 %991  ;;  %v294_v17 = vadd.f32 1.1920929e-07, %v293_v15  ;;  %v2581_v15 = vld [vmem:[#allocation5] ss:$4 sm:$0x3] }
 0x1ae   :  { %v2550_v46 = vpop.eup %2549  ;;  %v1026_v1 = vpop.xlane.xlu1 %1025 }
 0x1af   :  { %v507_v32 = vmul.f32 %v2550_v46, %v505_v3  ;;  %v1027_v50 = vmul.f32 %v1026_v1, %v992_v20  ;;  %v564_v46 = vmul.f32 %v2581_v15, %v2581_v15  ;;  %v2582_v1 = vld [vmem:[#allocation5 + $0x8] ss:$4 sm:$0x3] }
 0x1b1   :  { %v1436_v27 = vpop.xlane.xlu0 %1435  ;;  %2553 = vrsqrt.f32 %v1027_v50  ;;  %v509_v58 = vsel %vm508_vm3, %v505_v3, %v507_v32  ;;  %vm1030_vm7 = vcmp.eq.f32.partialorder %v1027_v50, inf  ;;  %v1033_v40 = vand.u32 2147483648, %v1027_v50 }
 0x1b2   :  { %v1470_v63 = vpop.xlane.xlu1 %1469  ;;  %v512_v48 = vsel %vm510_vm4, %v511_v36, %v509_v58  ;;  %2555 = vrcp.f32 %v294_v17  ;;  %vm1032_vm8 = vcmp.eq.f32.partialorder %v1027_v50, 0.0  ;;  %v565_v32 = vmul.f32 %v2582_v1, %v2582_v1 }
 0x1b3   :  { %v1471_v53 = vmul.f32 %v1470_v63, %v1436_v27  ;;  %v513_v60 = vadd.f32 1.1920929e-07, %v512_v48  ;;  %v533_v36 = vcombine.low %v529_v33, %v530_v51  ;;  %v2583_v63 = vld [vmem:[#allocation2 + $0x1] ss:$4 sm:$0x3]  ;;  %vm2454_vm3 = vcmask 9216  }
 0x1b4   :  { %v2552_v61 = vpop.eup %2551  ;;  %v1051_v48 = vmul.f32 %v2583_v63, %v2583_v63  ;;  %v2591_v51 = vld [vmem:[#allocation2 + $0x3] ss:$4 sm:$0x3] }
 0x1b5   :  { %v1654_v7 = vpop.xlane.xlu0 %1653  ;;  %v811_v52 = vmul.f32 %v2552_v61, %v809_v16  ;;  %2557 = vrsqrt.f32 %v1471_v53  ;;  %vm1474_vm9 = vcmp.eq.f32.partialorder %v1471_v53, inf  ;;  %v1477_v0 = vand.u32 2147483648, %v1471_v53 }
 0x1b6   :  { %v1688_v9 = vpop.xlane.xlu1 %1687  ;;  %2559 = vrcp.f32 %v513_v60  ;;  %vm1476_vm11 = vcmp.eq.f32.partialorder %v1471_v53, 0.0 }
 0x1b7   :  { %v1689_v35 = vmul.f32 %v1688_v9, %v1654_v7  ;;  %v813_v29 = vsel %vm812_vm5, %v809_v16, %v811_v52 }
 0x1b8   :  { %v816_v38 = vsel %vm814_vm6, %v815_v10, %v813_v29  ;;  %v568_v10 = vcombine.low %v564_v46, %v565_v32  ;;  %v2593_v32 = vld [vmem:[#allocation5 + $0x3] ss:$4 sm:$0x3] }
 0x1b9   :  { %v2029_v44 = vpop.xlane.xlu0 %2028  ;;  %2561 = vrsqrt.f32 %v1689_v35  ;;  %v817_v37 = vadd.f32 1.1920929e-07, %v816_v38  ;;  %vm1692_vm12 = vcmp.eq.f32.partialorder %v1689_v35, inf  ;;  %v1695_v24 = vand.u32 2147483648, %v1689_v35 }
 0x1ba   :  { %v2063_v26 = vpop.xlane.xlu1 %2062  ;;  %vm1694_vm13 = vcmp.eq.f32.partialorder %v1689_v35, 0.0 }
 0x1bb   :  { %v2554_v59 = vpop.eup %2553  ;;  %v3424_v4 = vmul.f32 %v2063_v26, %v2029_v44  ;;  %2563 = vrcp.f32 %v817_v37  ;;  %v2585_v37 = vld [vmem:[#allocation5 + $0x1] ss:$4 sm:$0x3] }
 0x1bc   :  { %v1029_v12 = vmul.f32 %v2554_v59, %v1027_v50  ;;  %v2556_v30 = vpop.eup %2555  ;;  %v1086_v26 = vmul.f32 %v2585_v37, %v2585_v37  ;;  %v2586_v59 = vld [vmem:[#allocation5 + $0x9] ss:$4 sm:$0x3] }
 0x1bd   :  { %v2247_v13 = vpop.xlane.xlu0 %2246  ;;  %2565 = vrsqrt.f32 %v3424_v4  ;;  %vm2067_vm14 = vcmp.eq.f32.partialorder %v3424_v4, inf  ;;  %v2070_v58 = vand.u32 2147483648, %v3424_v4  ;;  %vm2069_vm15 = vcmp.eq.f32.partialorder %v3424_v4, 0.0 }
 0x1be   :  { %v2281_v55 = vpop.xlane.xlu1 %2280  ;;  %v1031_v22 = vsel %vm1030_vm7, %v1027_v50, %v1029_v12  ;;  %v1087_v12 = vmul.f32 %v2586_v59, %v2586_v59 }
 0x1bf   :  { %v2558_v6 = vpop.eup %2557  ;;  %v3427_v41 = vmul.f32 %v2281_v55, %v2247_v13  ;;  %v1034_v18 = vsel %vm1032_vm8, %v1033_v40, %v1031_v22  ;;  %v540_v40 = vrot.slane %v533_v36, %v2891_v5 }
 0x1c0   :  { %v2560_v31 = vpop.eup %2559  ;;  %v1473_v45 = vmul.f32 %v2558_v6, %v1471_v53  ;;  %v1035_v47 = vadd.f32 1.1920929e-07, %v1034_v18  ;;  %v2587_v18 = vld [vmem:[#allocation2 + $0x2] ss:$4 sm:$0x3] }
 0x1c1   :  { %v217_v21 = vpop.xlane.xlu0 %216  ;;  %2567 = vrsqrt.f32 %v3427_v41  ;;  %vm2285_vm1 = vcmp.eq.f32.partialorder %v3427_v41, inf  ;;  %vm2287_vm2 = vcmp.eq.f32.partialorder %v3427_v41, 0.0 }
 0x1c2   :  { %v296_v49 = vmul.f32 %v2556_v30, %v217_v21  ;;  %v436_v14 = vpop.xlane.xlu1 %435  ;;  %2569 = vrcp.f32 %v1035_v47  ;;  %v1475_v54 = vsel %vm1474_vm9, %v1471_v53, %v1473_v45  ;;  %v2584_v53 = vld [vmem:[#allocation2 + $0x9] ss:$4 sm:$0x3]  ;;  %v2588_v45 = vld [vmem:[#allocation2 + $0xa] ss:$4 sm:$0x3] }
 0x1c3   :  { %v2562_v11 = vpop.eup %2561  ;;  %v515_v25 = vmul.f32 %v2560_v31, %v436_v14  ;;  %v1478_v2 = vsel %vm1476_vm11, %v1477_v0, %v1475_v54  ;;  %v1052_v60 = vmul.f32 %v2584_v53, %v2584_v53  ;;  %v1713_v31 = vmul.f32 %v2587_v18, %v2587_v18 }
 0x1c4   :  { %v2508_v23 = vclamps-f32 %v296_v49, 1.0  ;;  %v1691_v43 = vmul.f32 %v2562_v11, %v1689_v35  ;;  %v1479_v28 = vadd.f32 1.1920929e-07, %v1478_v2  ;;  %v1714_v21 = vmul.f32 %v2588_v45, %v2588_v45  ;;  %v2589_v2 = vld [vmem:[#allocation5 + $0x2] ss:$4 sm:$0x3] }
 0x1c5   :  { %v2564_v34 = vpop.eup %2563  ;;  %v2509_v3 = vclamps-f32 %v515_v25, 1.0  ;;  %v740_v39 = vpop.xlane.xlu0 %739  ;;  %v1055_v55 = vcombine.low %v1051_v48, %v1052_v60  ;;  %v575_v14 = vrot.slane %v568_v10, %v2891_v5  ;;  %v1090_v54 = vcombine.low %v1086_v26, %v1087_v12 }
 0x1c6   :  { %v300_v8 = vsel %vm299_vm10, %v2508_v23, 0.0  ;;  %v819_v16 = vmul.f32 %v2564_v34, %v740_v39  ;;  %2571 = vrcp.f32 %v1479_v28  ;;  %v1693_v57 = vsel %vm1692_vm12, %v1689_v35, %v1691_v43  ;;  %v958_v44 = vpop.xlane.xlu1 %957  ;;  %v2590_v28 = vld [vmem:[#allocation5 + $0xa] ss:$4 sm:$0x3] }
 0x1c7   :  { %301 = vadd.xlane.f32.xlu0 %v300_v8  ;;  %v2566_v42 = vpop.eup %2565  ;;  %v1696_v19 = vsel %vm1694_vm13, %v1695_v24, %v1693_v57  ;;  %v518_v20 = vsel %vm299_vm10, %v2509_v3, 0.0  ;;  %v541_v25 = vcombine.high %v540_v40, %v540_v40  ;;  %v1748_v43 = vmul.f32 %v2589_v2, %v2589_v2  ;;  %v2592_v3 = vld [vmem:[#allocation2 + $0xb] ss:$4 sm:$0x3] }
 0x1c8   :  { %v2066_v50 = vmul.f32 %v2566_v42, %v3424_v4  ;;  %v2510_v27 = vclamps-f32 %v819_v16, 1.0  ;;  %v1697_v17 = vadd.f32 1.1920929e-07, %v1696_v19  ;;  %519 = vadd.xlane.f32.xlu1 %v518_v20  ;;  %v1749_v56 = vmul.f32 %v2590_v28, %v2590_v28 }
 0x1c9   :  { %v1402_v49 = vpop.xlane.xlu0 %1401  ;;  %v1717_v62 = vcombine.low %v1713_v31, %v1714_v21  ;;  %v2306_v34 = vmul.f32 %v2591_v51, %v2591_v51  ;;  %v2307_v39 = vmul.f32 %v2592_v3, %v2592_v3  ;;  %v576_v16 = vcombine.high %v575_v14, %v575_v14 }
 0x1ca   :  { %2573 = vrcp.f32 %v1697_v17  ;;  %v2068_v61 = vsel %vm2067_vm14, %v3424_v4, %v2066_v50  ;;  %v822_v7 = vsel %vm299_vm10, %v2510_v27, 0.0  ;;  %v2288_v4 = vand.u32 2147483648, %v3427_v41  ;;  %v1620_v24 = vpop.xlane.xlu1 %1619  ;;  %v2594_v27 = vld [vmem:[#allocation5 + $0xb] ss:$4 sm:$0x3] }
 0x1cb   :  { %v2568_v52 = vpop.eup %2567  ;;  %v2071_v9 = vsel %vm2069_vm15, %v2070_v58, %v2068_v61  ;;  %823 = vadd.xlane.f32.xlu0 %v822_v7  ;;  %v1097_v57 = vrot.slane %v1090_v54, %v2891_v5  ;;  %v548_v20 = vrot.slane %v540_v40, %v2891_v5  ;;  %v555_v15 = vrot.slane %v541_v25, %v2891_v5 }
 0x1cc   :  { %v2570_v35 = vpop.eup %2569  ;;  %v2284_v29 = vmul.f32 %v2568_v52, %v3427_v41  ;;  %v2072_v38 = vadd.f32 1.1920929e-07, %v2071_v9  ;;  %v1752_v1 = vcombine.low %v1748_v43, %v1749_v56  ;;  %v2341_v50 = vmul.f32 %v2593_v32, %v2593_v32 }
 0x1cd   :  { %v1037_v13 = vmul.f32 %v2570_v35, %v958_v44  ;;  %v2342_v17 = vmul.f32 %v2594_v27, %v2594_v27  ;;  %v1724_v58 = vrot.slane %v1717_v62, %v2891_v5  ;;  %v2310_v63 = vcombine.low %v2306_v34, %v2307_v39  ;;  %v1995_v53 = vpop.xlane.xlu0 %1994  ;;  %v1257_v27 = vpop.f32.mrb[0].mxu1 }
 0x1ce   :  { %2575 = vrcp.f32 %v2072_v38  ;;  %v2286_v30 = vsel %vm2285_vm1, %v3427_v41, %v2284_v29  ;;  %v1062_v41 = vrot.slane %v1055_v55, %v2891_v5  ;;  %v583_v60 = vrot.slane %v575_v14, %v2891_v5 }
 0x1cf   :  { %v2511_v22 = vclamps-f32 %v1037_v13, 1.0  ;;  %v2289_v6 = vsel %vm2287_vm2, %v2288_v4, %v2286_v30  ;;  %v590_v61 = vrot.slane %v576_v16, %v2891_v5  ;;  %v1098_v7 = vcombine.high %v1097_v57, %v1097_v57  ;;  %v2213_v4 = vpop.xlane.xlu1 %2212 }
 0x1d0   :  { %v2572_v47 = vpop.eup %2571  ;;  %v2290_v0 = vadd.f32 1.1920929e-07, %v2289_v6  ;;  %v1063_v46 = vcombine.high %v1062_v41, %v1062_v41  ;;  %v558_v10 = vsel %vm118_vm0, %v548_v20, 0.0  ;;  %v559_v35 = vsel %vm118_vm0, %v555_v15, 0.0 }
 0x1d1   :  { %v1481_v11 = vmul.f32 %v2572_v47, %v1402_v49  ;;  %v1040_v23 = vsel %vm299_vm10, %v2511_v22, 0.0  ;;  %v1070_v29 = vrot.slane %v1062_v41, %v2891_v5  ;;  %v1759_v38 = vrot.slane %v1752_v1, %v2891_v5 }
 0x1d2   :  { %2577 = vrcp.f32 %v2290_v0  ;;  %1041 = vadd.xlane.f32.xlu1 %v1040_v23  ;;  %v1077_v44 = vrot.slane %v1063_v46, %v2891_v5  ;;  %v2345_v37 = vcombine.low %v2341_v50, %v2342_v17  ;;  %v1725_v59 = vcombine.high %v1724_v58, %v1724_v58  ;;  %v2442_v17 = vpop.f32.mrb[0].mxu0 }
 0x1d3   :  { %v2512_v33 = vclamps-f32 %v1481_v11, 1.0  ;;  %v2317_v12 = vrot.slane %v2310_v63, %v2891_v5  ;;  %v593_v40 = vsel %vm118_vm0, %v583_v60, 0.0  ;;  %v594_v30 = vsel %vm118_vm0, %v590_v61, 0.0 }
 0x1d4   :  { %v2574_v8 = vpop.eup %2573  ;;  %v1105_v55 = vrot.slane %v1097_v57, %v2891_v5  ;;  %v560_v18 = vadd.f32 %v559_v35, %v558_v10  ;;  %v1112_v31 = vrot.slane %v1098_v7, %v2891_v5  ;;  %v1080_v45 = vsel %vm118_vm0, %v1070_v29, 0.0 }
 0x1d5   :  { %v1699_v42 = vmul.f32 %v2574_v8, %v1620_v24  ;;  %v1484_v19 = vsel %vm299_vm10, %v2512_v33, 0.0  ;;  %v1081_v21 = vsel %vm118_vm0, %v1077_v44, 0.0  ;;  %v1760_v47 = vcombine.high %v1759_v38, %v1759_v38 }
 0x1d6   :  { %1485 = vadd.xlane.f32.xlu0 %v1484_v19  ;;  %v2352_v49 = vrot.slane %v2345_v37, %v2891_v5  ;;  %v1732_v14 = vrot.slane %v1724_v58, %v2891_v5  ;;  %v1739_v54 = vrot.slane %v1725_v59, %v2891_v5  ;;  %v2318_v11 = vcombine.high %v2317_v12, %v2317_v12  ;;  %v2444_v58 = vpop.f32.mrb[1].mxu0 }
 0x1d7   :  { %v2513_v36 = vclamps-f32 %v1699_v42, 1.0  ;;  %v595_v25 = vadd.f32 %v594_v30, %v593_v40  ;;  %v1115_v41 = vsel %vm118_vm0, %v1105_v55, 0.0  ;;  %v1767_v2 = vrot.slane %v1759_v38, %v2891_v5 }
 0x1d8   :  { %v2576_v48 = vpop.eup %2575  ;;  %v1116_v43 = vsel %vm118_vm0, %v1112_v31, 0.0  ;;  %v1082_v28 = vadd.f32 %v1081_v21, %v1080_v45  ;;  %v1774_v56 = vrot.slane %v1760_v47, %v2891_v5  ;;  %v2353_v33 = vcombine.high %v2352_v49, %v2352_v49 }
 0x1d9   :  { %v2074_v52 = vmul.f32 %v2576_v48, %v1995_v53  ;;  %v1702_v9 = vsel %vm299_vm10, %v2513_v36, 0.0  ;;  %v1742_v62 = vsel %vm118_vm0, %v1732_v14, 0.0  ;;  %v1743_v51 = vsel %vm118_vm0, %v1739_v54, 0.0 }
 0x1da   :  { %1703 = vadd.xlane.f32.xlu1 %v1702_v9  ;;  %v2325_v34 = vrot.slane %v2317_v12, %v2891_v5  ;;  %v2332_v3 = vrot.slane %v2318_v11, %v2891_v5  ;;  %v1117_v39 = vadd.f32 %v1116_v43, %v1115_v41  ;;  %v1777_v8 = vsel %vm118_vm0, %v1767_v2, 0.0 }
 0x1db   :  { %v2514_v26 = vclamps-f32 %v2074_v52, 1.0  ;;  %v1778_v24 = vsel %vm118_vm0, %v1774_v56, 0.0  ;;  %v1744_v16 = vadd.f32 %v1743_v51, %v1742_v62  ;;  %v2360_v57 = vrot.slane %v2352_v49, %v2891_v5 }
 0x1dc   :  { %v2578_v13 = vpop.eup %2577  ;;  %v2367_v42 = vrot.slane %v2353_v33, %v2891_v5  ;;  %v2335_v19 = vsel %vm118_vm0, %v2325_v34, 0.0  ;;  %v2336_v20 = vsel %vm118_vm0, %v2332_v3, 0.0  ;;  %v1779_v15 = vadd.f32 %v1778_v24, %v1777_v8  ;;  %v1259_v5 = vpop.f32.mrb[1].mxu1 }
 0x1dd   :  { %v2292_v22 = vmul.f32 %v2578_v13, %v2213_v4  ;;  %v2077_v6 = vsel %vm299_vm10, %v2514_v26, 0.0  ;;  %v2337_v46 = vadd.f32 %v2336_v20, %v2335_v19  ;;  %v2370_v1 = vsel %vm118_vm0, %v2360_v57, 0.0 }
 0x1de   :  { %2078 = vadd.xlane.f32.xlu0 %v2077_v6  ;;  %v2371_v32 = vsel %vm118_vm0, %v2367_v42, 0.0  ;;  %v2516_v36 = vadd.f32 %v2442_v17, %v1257_v27  ;;  %vm2448_vm0 = vcmask 0  }
 0x1df   :  { %v2515_v0 = vclamps-f32 %v2292_v22, 1.0  ;;  %v2372_v50 = vadd.f32 %v2371_v32, %v2370_v1 }
 0x1e0   :  { %2455 = vst.msk [vmem:[#allocation13] sm:$0x3] %vm2454_vm3, %v2516_v36 }
 0x1e1   :  { %v2295_v23 = vsel %vm299_vm10, %v2515_v0, 0.0 }
 0x1e2   :  { %2296 = vadd.xlane.f32.xlu1 %v2295_v23  ;;  %561 = vadd.xlane.f32.xlu0 %v560_v18 }
 0x1e6   :  { %596 = vadd.xlane.f32.xlu1 %v595_v25  ;;  %1083 = vadd.xlane.f32.xlu0 %v1082_v28 }
 0x1ea   :  { %1118 = vadd.xlane.f32.xlu1 %v1117_v39  ;;  %1745 = vadd.xlane.f32.xlu0 %v1744_v16 }
 0x1ee   :  { %1780 = vadd.xlane.f32.xlu1 %v1779_v15  ;;  %2338 = vadd.xlane.f32.xlu0 %v2337_v46 }
 0x1f2   :  { %2373 = vadd.xlane.f32.xlu1 %v2372_v50 }
 0x254   :  { %v302_v63 = vpop.xlane.xlu0 %301 }
 0x255   :  { %v303_v48 = vrot.slane %v302_v63, 4  ;;  %v520_v53 = vpop.xlane.xlu1 %519 }
 0x256   :  { %v521_v61 = vrot.slane %v520_v53, 4 }
 0x257   :  { %v304_v60 = vadd.f32 %v303_v48, %v302_v63 }
 0x258   :  { %v522_v52 = vadd.f32 %v521_v61, %v520_v53  ;;  %v824_v9 = vpop.xlane.xlu0 %823 }
 0x259   :  { %v305_v7 = vrot.slane %v304_v60, 2  ;;  %v825_v10 = vrot.slane %v824_v9, 4 }
 0x25a   :  { %v523_v35 = vrot.slane %v522_v52, 2 }
 0x25b   :  { %v306_v29 = vadd.f32 %v305_v7, %v304_v60  ;;  %v826_v44 = vadd.f32 %v825_v10, %v824_v9 }
 0x25c   :  { %v524_v37 = vadd.f32 %v523_v35, %v522_v52 }
 0x25d   :  { %v307_v38 = vrot.slane %v306_v29, 1  ;;  %v827_v26 = vrot.slane %v826_v44, 2 }
 0x25e   :  { %v525_v12 = vrot.slane %v524_v37, 1 }
 0x25f   :  { %v308_v59 = vadd.f32 %v307_v38, %v306_v29  ;;  %v1042_v13 = vpop.xlane.xlu1 %1041  ;;  %v828_v4 = vadd.f32 %v827_v26, %v826_v44 }
 0x260   :  { %v1043_v40 = vrot.slane %v1042_v13, 4  ;;  %v526_v30 = vadd.f32 %v525_v12, %v524_v37 }
 0x261   :  { %2521 = vpush %v308_v59  ;;  %v829_v55 = vrot.slane %v828_v4, 1 }
 0x262   :  { %v1044_v22 = vadd.f32 %v1043_v40, %v1042_v13  ;;  %2523 = vpush %v526_v30 }
 0x263   :  { %v1486_v6 = vpop.xlane.xlu0 %1485  ;;  %v830_v18 = vadd.f32 %v829_v55, %v828_v4 }
 0x264   :  { %v1045_v31 = vrot.slane %v1044_v22, 2  ;;  %v1487_v45 = vrot.slane %v1486_v6, 4 }
 0x265   :  { %2525 = vpush %v830_v18 }
 0x266   :  { %v1488_v21 = vadd.f32 %v1487_v45, %v1486_v6  ;;  %v1046_v47 = vadd.f32 %v1045_v31, %v1044_v22 }
 0x267   :  { %v1704_v49 = vpop.xlane.xlu1 %1703 }
 0x268   :  { %v1489_v0 = vrot.slane %v1488_v21, 2  ;;  %v1705_v14 = vrot.slane %v1704_v49, 4  ;;  %v1047_v54 = vrot.slane %v1046_v47, 1 }
 0x26a   :  { %v1706_v11 = vadd.f32 %v1705_v14, %v1704_v49  ;;  %v1048_v23 = vadd.f32 %v1047_v54, %v1046_v47  ;;  %v1490_v25 = vadd.f32 %v1489_v0, %v1488_v21 }
 0x26b   :  { %v2079_v41 = vpop.xlane.xlu0 %2078 }
 0x26c   :  { %v1707_v2 = vrot.slane %v1706_v11, 2  ;;  %v2080_v43 = vrot.slane %v2079_v41, 4  ;;  %2527 = vpush %v1048_v23  ;;  %v1491_v28 = vrot.slane %v1490_v25, 1 }
 0x26e   :  { %v2081_v56 = vadd.f32 %v2080_v43, %v2079_v41  ;;  %v1492_v33 = vadd.f32 %v1491_v28, %v1490_v25  ;;  %v1708_v62 = vadd.f32 %v1707_v2, %v1706_v11 }
 0x26f   :  { %v2297_v51 = vpop.xlane.xlu1 %2296  ;;  %v562_v34 = vpop.xlane.xlu0 %561 }
 0x270   :  { %v2082_v3 = vrot.slane %v2081_v56, 2  ;;  %v2298_v39 = vrot.slane %v2297_v51, 4  ;;  %2529 = vpush %v1492_v33  ;;  %v1709_v8 = vrot.slane %v1708_v62, 1 }
 0x272   :  { %v2299_v24 = vadd.f32 %v2298_v39, %v2297_v51  ;;  %v1710_v16 = vadd.f32 %v1709_v8, %v1708_v62  ;;  %v2083_v57 = vadd.f32 %v2082_v3, %v2081_v56 }
 0x273   :  { %v597_v42 = vpop.xlane.xlu1 %596  ;;  %v1084_v19 = vpop.xlane.xlu0 %1083 }
 0x274   :  { %v2300_v20 = vrot.slane %v2299_v24, 2  ;;  %2531 = vpush %v1710_v16  ;;  %v2084_v15 = vrot.slane %v2083_v57, 1  ;;  %v1085_v46 = vadd.f32 %v1084_v19, %v562_v34 }
 0x276   :  { %v2085_v1 = vadd.f32 %v2084_v15, %v2083_v57  ;;  %v2301_v32 = vadd.f32 %v2300_v20, %v2299_v24 }
 0x277   :  { %v1119_v50 = vpop.xlane.xlu1 %1118  ;;  %v1746_v27 = vpop.xlane.xlu0 %1745 }
 0x278   :  { %2533 = vpush %v2085_v1  ;;  %v2302_v17 = vrot.slane %v2301_v32, 1  ;;  %v1120_v36 = vadd.f32 %v1119_v50, %v597_v42  ;;  %v1747_v5 = vadd.f32 %v1746_v27, %v1085_v46 }
 0x27a   :  { %v2303_v58 = vadd.f32 %v2302_v17, %v2301_v32 }
 0x27b   :  { %v1781_v63 = vpop.xlane.xlu1 %1780  ;;  %v2339_v48 = vpop.xlane.xlu0 %2338 }
 0x27c   :  { %2535 = vpush %v2303_v58  ;;  %v1782_v53 = vadd.f32 %v1781_v63, %v1120_v36  ;;  %v2340_v60 = vadd.f32 %v2339_v48, %v1747_v5 }
 0x27e   :  { %2452 = vst.msk [vmem:[%s3548_s6] sm:$0x3] %vm299_vm10, %v2340_v60 }
 0x27f   :  { %v2374_v61 = vpop.xlane.xlu1 %2373 }
 0x280   :  { %v2375_v7 = vadd.f32 %v2374_v61, %v1782_v53 }
 0x282   :  { %2453 = vst.msk [vmem:[%s3549_s7] sm:$0x3] %vm299_vm10, %v2375_v7 }
 0x292   :  { %s2522_s11 = spop %2521 }
 0x293   :  { %s2524_s12 = spop %2523 }
 0x296   :  { %s2526_s13 = spop %2525 }
 0x297   :  { %s832_s16 = sadd.f32 %s2526_s13, %s2522_s11 }
 0x29d   :  { %s2528_s14 = spop %2527 }
 0x29e   :  { %s1050_s30 = sadd.f32 %s2528_s14, %s2524_s12 }
 0x2a1   :  { %s2530_s15 = spop %2529 }
 0x2a2   :  { %s1494_s21 = sadd.f32 %s2530_s15, %s832_s16 }
 0x2a5   :  { %s2532_s0 = spop %2531 }
 0x2a6   :  { %s1712_s25 = sadd.f32 %s2532_s0, %s1050_s30 }
 0x2a9   :  { %s2534_s22 = spop %2533 }
 0x2aa   :  { %s2087_s6 = sadd.f32 %s2534_s22, %s1494_s21 }
 0x2ac   :  { %v2447_v52 = vstv %s2087_s6 }
 0x2ad   :  { %s2536_s7 = spop %2535  ;;  %2449 = vst.msk [vmem:[#allocation10] sm:$0x1] %vm2448_vm0, %v2447_v52 }
 0x2ae   :  { %s2305_s29 = sadd.f32 %s2536_s7, %s1712_s25 }
 0x2af   :  { %2694 = shalt.err (!%p2691_p8)
}
 0x2b0   :  { %s2695_s3 = scalar_lea.hbm %s3546_s4, 16 }
 0x2b1   :  { %p2696_p9 = scmp.ne.s32.totalorder %s3546_s4, %s2695_s3  ;;  %p2699_p10 = scmp.lt.u32.totalorder %s2695_s3, %s3546_s4 }
 0x2b3   :  { %p2701_p11 = pnand %p2699_p10, %p2696_p9 }
 0x2b5   :  { %2704 = shalt.err (!%p2701_p11)
}
 0x2b6   :  { %2465 = dma.vmem_to_hbm [thread:$0]  %s2463_s20, 16, %s3546_s4, [#allocation4]   ;;  %v2450_v9 = vstv %s2305_s29 }
 0x2b7   :  { %2451 = vst.msk [vmem:[#allocation11] sm:$0x1] %vm2448_vm0, %v2450_v9  ;;  %s2705_s14 = scalar_lea.vmem %s3497_s24, 16  ;;  %s2709_s15 = scalar_lea.vmem %s3497_s24, 32 }
 0x2b8   :  { %p2706_p12 = scmp.ne.s32.totalorder %s3497_s24, %s2705_s14  ;;  %p2710_p13 = scmp.lt.s32.totalorder %s3497_s24, %s3497_s24 }
 0x2b9   :  { %p2711_p0 = scmp.lt.s32.totalorder %s2709_s15, %s2705_s14 }
 0x2bb   :  { %p2712_p1 = por %p2711_p0, %p2710_p13 }
 0x2bd   :  { %p2713_p2 = pnand %p2712_p1, %p2706_p12 }
 0x2bf   :  { %2716 = shalt.err (!%p2713_p2)
}
 0x2c0   :  { %s2717_s21 = scalar_lea.hbm %s3547_s5, 16 }
 0x2c1   :  { %p2718_p3 = scmp.ne.s32.totalorder %s3547_s5, %s2717_s21  ;;  %p2721_p4 = scmp.lt.u32.totalorder %s2717_s21, %s3547_s5 }
 0x2c3   :  { %p2723_p5 = pnand %p2721_p4, %p2718_p3 }
 0x2c5   :  { %2726 = shalt.err (!%p2723_p5)
}
 0x2c6   :  { %2475 = dma.vmem_to_hbm [thread:$0]  %s3497_s24, 16, %s3547_s5, [#allocation12]  }
 0x2c7   :  { %s2727_s23 = scalar_lea.vmem %s2487_s27, 32  ;;  %p2732_p7 = scmp.lt.s32.totalorder %s2487_s27, %s2487_s27 }
 0x2c8   :  { %p2728_p6 = scmp.ne.s32.totalorder %s2487_s27, %s2727_s23  ;;  %p2733_p8 = scmp.lt.s32.totalorder %s2727_s23, %s2727_s23 }
 0x2ca   :  { %p2734_p9 = por %p2733_p8, %p2732_p7 }
 0x2cc   :  { %p2735_p10 = pnand %p2734_p9, %p2728_p6 }
 0x2ce   :  { %2738 = shalt.err (!%p2735_p10)
}
 0x2cf   :  { %s2739_s26 = scalar_lea.hbm %s3550_s8, 32 }
 0x2d0   :  { %p2740_p11 = scmp.ne.s32.totalorder %s3550_s8, %s2739_s26  ;;  %p2743_p12 = scmp.lt.u32.totalorder %s2739_s26, %s3550_s8 }
 0x2d2   :  { %p2745_p13 = pnand %p2743_p12, %p2740_p11 }
 0x2d4   :  { %2748 = shalt.err (!%p2745_p13)
}
 0x2d5   :  { %2489 = dma.vmem_to_hbm [thread:$0]  %s2487_s27, 32, %s3550_s8, [#allocation12]  }
 0x2d6   :  { %2755 = dma.done.wait [#allocation4], 16  }
 0x2d7   :  { %2756 = vsyncadd [#allocation4], 4294967280 }
 0x2d8   :  { %2757 = dma.done.wait [#allocation12], 48  }
 0x2d9   :  { %2758 = vsyncadd [#allocation12], 4294967248 }
 0x2da   :  { %2503 = vsyncpa [#allocation3], 1 }
 0x2db   :  { %2504 = vsyncpa [#allocation6], 1 }
 0x2dc   :  { %2505 = vsyncpa [#allocation9], 1 }
 0x2dd   :  { %2506 = vsyncpa [#allocation4], 1 }
 0x2de   :  { %2507 = vsyncpa [#allocation12], 1 }

</bundles_post_ra>
